<compile_context>
chip_gen: v7x
topology: tpu7x:2x2x1
jax: 0.10.0
libtpu: 0.0.40
codegen_flags: <defaults>
</compile_context>

<pallas_src>
import jax
import jax.numpy as jnp
from jax.experimental import pallas as pl
from jax.experimental.pallas import tpu as pltpu

C_IN = 3
C_OUT = 3
KH = 3
KW = 3


def conv_bn_relu_kernel(x_ref, w_ref, b_ref, o_ref):
    # x_ref: (C_IN, H, W)            VMEM, one image per grid step (W on lanes)
    # w_ref: (C_OUT*C_IN*KH*KW,)     SMEM, BN-folded weights, flat OIHW order
    # b_ref: (C_OUT,)                SMEM, BN-folded bias
    # o_ref: (C_OUT, Hout, Wout)     VMEM
    h_out, w_out = o_ref.shape[1], o_ref.shape[2]

    # Per-output-channel accumulators, initialized with the folded BN bias.
    acc = [jnp.full((h_out, w_out), b_ref[co], jnp.float32)
           for co in range(C_OUT)]

    # Shift-and-MAC convolution on the VPU.  Each (ci, kh, kw) tap window is a
    # static (Hout, Wout) select from the (H, W) channel slab; it is computed
    # once and shared by all three output channels (27 windows, 81 MACs).
    for ci in range(C_IN):
        x_c = x_ref[ci]                                     # (H, W) float32
        for kh in range(KH):
            for kw in range(KW):
                tap = x_c[kh:kh + h_out, kw:kw + w_out]     # static window
                for co in range(C_OUT):
                    w_s = w_ref[((co * C_IN + ci) * KH + kh) * KW + kw]
                    acc[co] = acc[co] + w_s * tap

    for co in range(C_OUT):
        o_ref[co] = jnp.maximum(acc[co], 0.0).astype(o_ref.dtype)   # ReLU


def conv_bn_relu(x_nchw, w_oihw, gamma, beta, running_mean, running_var,
                 eps=1e-5):
    """x_nchw: (N, 3, H, W) float32. Returns (N, 3, H-2, W-2) float32 (NCHW)."""
    n, c, h, w = x_nchw.shape
    assert c == C_IN
    h_out, w_out = h - (KH - 1), w - (KW - 1)

    # Fold inference-mode BatchNorm into conv weight + bias (conv has no bias).
    scale = gamma / jnp.sqrt(running_var + eps)              # (C_OUT,)
    shift = beta - running_mean * scale                      # (C_OUT,)
    w_folded = (w_oihw * scale[:, None, None, None]).astype(jnp.float32)
    w_flat = w_folded.reshape(-1)    # OIHW flat: ((co*C_IN+ci)*KH+kh)*KW+kw
    b_flat = shift.astype(jnp.float32)

    out = pl.pallas_call(
        conv_bn_relu_kernel,
        out_shape=jax.ShapeDtypeStruct((n, C_OUT, h_out, w_out), jnp.float32),
        grid_spec=pltpu.PrefetchScalarGridSpec(
            num_scalar_prefetch=0,
            grid=(n,),
            in_specs=[
                # One whole NCHW image per grid step; batch dim squeezed.
                pl.BlockSpec((None, C_IN, h, w), lambda i: (i, 0, 0, 0)),
                # Tiny weight / bias tables as SMEM scalars (no VMEM padding).
                pl.BlockSpec(memory_space=pltpu.MemorySpace.SMEM),
                pl.BlockSpec(memory_space=pltpu.MemorySpace.SMEM),
            ],
            out_specs=pl.BlockSpec((None, C_OUT, h_out, w_out),
                                   lambda i: (i, 0, 0, 0)),
        ),
        compiler_params=pltpu.CompilerParams(
            dimension_semantics=("parallel",)),
    )(x_nchw, w_flat, b_flat)
    return out


def _reference(x_nchw, w_oihw, gamma, beta, running_mean, running_var,
               eps=1e-5):
    y = jax.lax.conv_general_dilated(
        x_nchw, w_oihw, window_strides=(1, 1), padding="VALID",
        dimension_numbers=("NCHW", "OIHW", "NCHW"))
    scale = gamma / jnp.sqrt(running_var + eps)
    shift = beta - running_mean * scale
    y = y * scale[None, :, None, None] + shift[None, :, None, None]
    return jnp.maximum(y, 0.0)


if __name__ == "__main__":
    key = jax.random.PRNGKey(0)
    k_x, k_w, k_g, k_b, k_m, k_v = jax.random.split(key, 6)

    # Small shapes consistent with the module: batch=2, channels=3, spatial=16.
    x = jax.random.normal(k_x, (2, 3, 16, 16), dtype=jnp.float32)

    # Deterministic synthetic parameters (Conv2d(3,3,3,bias=False) + BatchNorm2d(3)).
    w = jax.random.normal(k_w, (3, 3, 3, 3), dtype=jnp.float32) * 0.2   # OIHW
    gamma = 1.0 + 0.1 * jax.random.normal(k_g, (3,), dtype=jnp.float32)
    beta = 0.1 * jax.random.normal(k_b, (3,), dtype=jnp.float32)
    running_mean = 0.05 * jax.random.normal(k_m, (3,), dtype=jnp.float32)
    running_var = 1.0 + 0.1 * jax.random.uniform(k_v, (3,), dtype=jnp.float32)

    out = conv_bn_relu(x, w, gamma, beta, running_mean, running_var)
    out = jax.block_until_ready(out)

    ref = _reference(x, w, gamma, beta, running_mean, running_var)
    assert out.shape == (2, 3, 14, 14), out.shape
    assert jnp.allclose(out, ref, atol=1e-4, rtol=1e-4), \
        float(jnp.max(jnp.abs(out - ref)))

    print("KERNEL_OK")
</pallas_src>

<mosaic_0001>
module attributes {stable_mosaic.version = 11 : i64} {
  func.func @conv_bn_relu_kernel(%arg0: i32, %arg1: memref<1x3x16x16xf32, #tpu.memory_space<vmem>>, %arg2: memref<81xf32, #tpu.memory_space<smem>>, %arg3: memref<3xf32, #tpu.memory_space<smem>>, %arg4: memref<1x3x14x14xf32, #tpu.memory_space<vmem>>) attributes {dimension_semantics = [#tpu.dimension_semantics<parallel>], iteration_bounds = array<i64: 2>, scalar_prefetch = 0 : i64, scratch_operands = 0 : i64, tpu.core_type = #tpu.core_type<tc>, window_params = [{transform_indices = @transform_0, window_bounds = array<i64: 1, 3, 16, 16>}, {transform_indices = @transform_1, window_bounds = array<i64: 81>}, {transform_indices = @transform_2, window_bounds = array<i64: 3>}, {transform_indices = @transform_3, window_bounds = array<i64: 1, 3, 14, 14>}]} {
    %c0 = arith.constant 0 : index
    %0 = memref.load %arg3[%c0] : memref<3xf32, #tpu.memory_space<smem>>
    %1 = vector.broadcast %0 : f32 to vector<14x14xf32>
    %c1 = arith.constant 1 : index
    %2 = memref.load %arg3[%c1] : memref<3xf32, #tpu.memory_space<smem>>
    %3 = vector.broadcast %2 : f32 to vector<14x14xf32>
    %c2 = arith.constant 2 : index
    %4 = memref.load %arg3[%c2] : memref<3xf32, #tpu.memory_space<smem>>
    %5 = vector.broadcast %4 : f32 to vector<14x14xf32>
    %c0_0 = arith.constant 0 : index
    %c0_1 = arith.constant 0 : index
    %c0_2 = arith.constant 0 : index
    %c0_3 = arith.constant 0 : index
    %6 = vector.load %arg1[%c0_0, %c0_1, %c0_2, %c0_3] : memref<1x3x16x16xf32, #tpu.memory_space<vmem>>, vector<1x1x16x16xf32>
    %7 = vector.shape_cast %6 : vector<1x1x16x16xf32> to vector<16x16xf32>
    %8 = vector.extract_strided_slice %7 {offsets = [0, 0], sizes = [14, 14], strides = [1, 1]} : vector<16x16xf32> to vector<14x14xf32>
    %c0_4 = arith.constant 0 : index
    %9 = memref.load %arg2[%c0_4] : memref<81xf32, #tpu.memory_space<smem>>
    %10 = vector.broadcast %9 : f32 to vector<14x14xf32>
    %11 = arith.mulf %10, %8 : vector<14x14xf32>
    %12 = arith.addf %1, %11 : vector<14x14xf32>
    %c27 = arith.constant 27 : index
    %13 = memref.load %arg2[%c27] : memref<81xf32, #tpu.memory_space<smem>>
    %14 = vector.broadcast %13 : f32 to vector<14x14xf32>
    %15 = arith.mulf %14, %8 : vector<14x14xf32>
    %16 = arith.addf %3, %15 : vector<14x14xf32>
    %c54 = arith.constant 54 : index
    %17 = memref.load %arg2[%c54] : memref<81xf32, #tpu.memory_space<smem>>
    %18 = vector.broadcast %17 : f32 to vector<14x14xf32>
    %19 = arith.mulf %18, %8 : vector<14x14xf32>
    %20 = arith.addf %5, %19 : vector<14x14xf32>
    %21 = vector.extract_strided_slice %7 {offsets = [0, 1], sizes = [14, 14], strides = [1, 1]} : vector<16x16xf32> to vector<14x14xf32>
    %c1_5 = arith.constant 1 : index
    %22 = memref.load %arg2[%c1_5] : memref<81xf32, #tpu.memory_space<smem>>
    %23 = vector.broadcast %22 : f32 to vector<14x14xf32>
    %24 = arith.mulf %23, %21 : vector<14x14xf32>
    %25 = arith.addf %12, %24 : vector<14x14xf32>
    %c28 = arith.constant 28 : index
    %26 = memref.load %arg2[%c28] : memref<81xf32, #tpu.memory_space<smem>>
    %27 = vector.broadcast %26 : f32 to vector<14x14xf32>
    %28 = arith.mulf %27, %21 : vector<14x14xf32>
    %29 = arith.addf %16, %28 : vector<14x14xf32>
    %c55 = arith.constant 55 : index
    %30 = memref.load %arg2[%c55] : memref<81xf32, #tpu.memory_space<smem>>
    %31 = vector.broadcast %30 : f32 to vector<14x14xf32>
    %32 = arith.mulf %31, %21 : vector<14x14xf32>
    %33 = arith.addf %20, %32 : vector<14x14xf32>
    %34 = vector.extract_strided_slice %7 {offsets = [0, 2], sizes = [14, 14], strides = [1, 1]} : vector<16x16xf32> to vector<14x14xf32>
    %c2_6 = arith.constant 2 : index
    %35 = memref.load %arg2[%c2_6] : memref<81xf32, #tpu.memory_space<smem>>
    %36 = vector.broadcast %35 : f32 to vector<14x14xf32>
    %37 = arith.mulf %36, %34 : vector<14x14xf32>
    %38 = arith.addf %25, %37 : vector<14x14xf32>
    %c29 = arith.constant 29 : index
    %39 = memref.load %arg2[%c29] : memref<81xf32, #tpu.memory_space<smem>>
    %40 = vector.broadcast %39 : f32 to vector<14x14xf32>
    %41 = arith.mulf %40, %34 : vector<14x14xf32>
    %42 = arith.addf %29, %41 : vector<14x14xf32>
    %c56 = arith.constant 56 : index
    %43 = memref.load %arg2[%c56] : memref<81xf32, #tpu.memory_space<smem>>
    %44 = vector.broadcast %43 : f32 to vector<14x14xf32>
    %45 = arith.mulf %44, %34 : vector<14x14xf32>
    %46 = arith.addf %33, %45 : vector<14x14xf32>
    %47 = vector.extract_strided_slice %7 {offsets = [1, 0], sizes = [14, 14], strides = [1, 1]} : vector<16x16xf32> to vector<14x14xf32>
    %c3 = arith.constant 3 : index
    %48 = memref.load %arg2[%c3] : memref<81xf32, #tpu.memory_space<smem>>
    %49 = vector.broadcast %48 : f32 to vector<14x14xf32>
    %50 = arith.mulf %49, %47 : vector<14x14xf32>
    %51 = arith.addf %38, %50 : vector<14x14xf32>
    %c30 = arith.constant 30 : index
    %52 = memref.load %arg2[%c30] : memref<81xf32, #tpu.memory_space<smem>>
    %53 = vector.broadcast %52 : f32 to vector<14x14xf32>
    %54 = arith.mulf %53, %47 : vector<14x14xf32>
    %55 = arith.addf %42, %54 : vector<14x14xf32>
    %c57 = arith.constant 57 : index
    %56 = memref.load %arg2[%c57] : memref<81xf32, #tpu.memory_space<smem>>
    %57 = vector.broadcast %56 : f32 to vector<14x14xf32>
    %58 = arith.mulf %57, %47 : vector<14x14xf32>
    %59 = arith.addf %46, %58 : vector<14x14xf32>
    %60 = vector.extract_strided_slice %7 {offsets = [1, 1], sizes = [14, 14], strides = [1, 1]} : vector<16x16xf32> to vector<14x14xf32>
    %c4 = arith.constant 4 : index
    %61 = memref.load %arg2[%c4] : memref<81xf32, #tpu.memory_space<smem>>
    %62 = vector.broadcast %61 : f32 to vector<14x14xf32>
    %63 = arith.mulf %62, %60 : vector<14x14xf32>
    %64 = arith.addf %51, %63 : vector<14x14xf32>
    %c31 = arith.constant 31 : index
    %65 = memref.load %arg2[%c31] : memref<81xf32, #tpu.memory_space<smem>>
    %66 = vector.broadcast %65 : f32 to vector<14x14xf32>
    %67 = arith.mulf %66, %60 : vector<14x14xf32>
    %68 = arith.addf %55, %67 : vector<14x14xf32>
    %c58 = arith.constant 58 : index
    %69 = memref.load %arg2[%c58] : memref<81xf32, #tpu.memory_space<smem>>
    %70 = vector.broadcast %69 : f32 to vector<14x14xf32>
    %71 = arith.mulf %70, %60 : vector<14x14xf32>
    %72 = arith.addf %59, %71 : vector<14x14xf32>
    %73 = vector.extract_strided_slice %7 {offsets = [1, 2], sizes = [14, 14], strides = [1, 1]} : vector<16x16xf32> to vector<14x14xf32>
    %c5 = arith.constant 5 : index
    %74 = memref.load %arg2[%c5] : memref<81xf32, #tpu.memory_space<smem>>
    %75 = vector.broadcast %74 : f32 to vector<14x14xf32>
    %76 = arith.mulf %75, %73 : vector<14x14xf32>
    %77 = arith.addf %64, %76 : vector<14x14xf32>
    %c32 = arith.constant 32 : index
    %78 = memref.load %arg2[%c32] : memref<81xf32, #tpu.memory_space<smem>>
    %79 = vector.broadcast %78 : f32 to vector<14x14xf32>
    %80 = arith.mulf %79, %73 : vector<14x14xf32>
    %81 = arith.addf %68, %80 : vector<14x14xf32>
    %c59 = arith.constant 59 : index
    %82 = memref.load %arg2[%c59] : memref<81xf32, #tpu.memory_space<smem>>
    %83 = vector.broadcast %82 : f32 to vector<14x14xf32>
    %84 = arith.mulf %83, %73 : vector<14x14xf32>
    %85 = arith.addf %72, %84 : vector<14x14xf32>
    %86 = vector.extract_strided_slice %7 {offsets = [2, 0], sizes = [14, 14], strides = [1, 1]} : vector<16x16xf32> to vector<14x14xf32>
    %c6 = arith.constant 6 : index
    %87 = memref.load %arg2[%c6] : memref<81xf32, #tpu.memory_space<smem>>
    %88 = vector.broadcast %87 : f32 to vector<14x14xf32>
    %89 = arith.mulf %88, %86 : vector<14x14xf32>
    %90 = arith.addf %77, %89 : vector<14x14xf32>
    %c33 = arith.constant 33 : index
    %91 = memref.load %arg2[%c33] : memref<81xf32, #tpu.memory_space<smem>>
    %92 = vector.broadcast %91 : f32 to vector<14x14xf32>
    %93 = arith.mulf %92, %86 : vector<14x14xf32>
    %94 = arith.addf %81, %93 : vector<14x14xf32>
    %c60 = arith.constant 60 : index
    %95 = memref.load %arg2[%c60] : memref<81xf32, #tpu.memory_space<smem>>
    %96 = vector.broadcast %95 : f32 to vector<14x14xf32>
    %97 = arith.mulf %96, %86 : vector<14x14xf32>
    %98 = arith.addf %85, %97 : vector<14x14xf32>
    %99 = vector.extract_strided_slice %7 {offsets = [2, 1], sizes = [14, 14], strides = [1, 1]} : vector<16x16xf32> to vector<14x14xf32>
    %c7 = arith.constant 7 : index
    %100 = memref.load %arg2[%c7] : memref<81xf32, #tpu.memory_space<smem>>
    %101 = vector.broadcast %100 : f32 to vector<14x14xf32>
    %102 = arith.mulf %101, %99 : vector<14x14xf32>
    %103 = arith.addf %90, %102 : vector<14x14xf32>
    %c34 = arith.constant 34 : index
    %104 = memref.load %arg2[%c34] : memref<81xf32, #tpu.memory_space<smem>>
    %105 = vector.broadcast %104 : f32 to vector<14x14xf32>
    %106 = arith.mulf %105, %99 : vector<14x14xf32>
    %107 = arith.addf %94, %106 : vector<14x14xf32>
    %c61 = arith.constant 61 : index
    %108 = memref.load %arg2[%c61] : memref<81xf32, #tpu.memory_space<smem>>
    %109 = vector.broadcast %108 : f32 to vector<14x14xf32>
    %110 = arith.mulf %109, %99 : vector<14x14xf32>
    %111 = arith.addf %98, %110 : vector<14x14xf32>
    %112 = vector.extract_strided_slice %7 {offsets = [2, 2], sizes = [14, 14], strides = [1, 1]} : vector<16x16xf32> to vector<14x14xf32>
    %c8 = arith.constant 8 : index
    %113 = memref.load %arg2[%c8] : memref<81xf32, #tpu.memory_space<smem>>
    %114 = vector.broadcast %113 : f32 to vector<14x14xf32>
    %115 = arith.mulf %114, %112 : vector<14x14xf32>
    %116 = arith.addf %103, %115 : vector<14x14xf32>
    %c35 = arith.constant 35 : index
    %117 = memref.load %arg2[%c35] : memref<81xf32, #tpu.memory_space<smem>>
    %118 = vector.broadcast %117 : f32 to vector<14x14xf32>
    %119 = arith.mulf %118, %112 : vector<14x14xf32>
    %120 = arith.addf %107, %119 : vector<14x14xf32>
    %c62 = arith.constant 62 : index
    %121 = memref.load %arg2[%c62] : memref<81xf32, #tpu.memory_space<smem>>
    %122 = vector.broadcast %121 : f32 to vector<14x14xf32>
    %123 = arith.mulf %122, %112 : vector<14x14xf32>
    %124 = arith.addf %111, %123 : vector<14x14xf32>
    %c0_7 = arith.constant 0 : index
    %c1_8 = arith.constant 1 : index
    %c0_9 = arith.constant 0 : index
    %c0_10 = arith.constant 0 : index
    %125 = vector.load %arg1[%c0_7, %c1_8, %c0_9, %c0_10] : memref<1x3x16x16xf32, #tpu.memory_space<vmem>>, vector<1x1x16x16xf32>
    %126 = vector.shape_cast %125 : vector<1x1x16x16xf32> to vector<16x16xf32>
    %127 = vector.extract_strided_slice %126 {offsets = [0, 0], sizes = [14, 14], strides = [1, 1]} : vector<16x16xf32> to vector<14x14xf32>
    %c9 = arith.constant 9 : index
    %128 = memref.load %arg2[%c9] : memref<81xf32, #tpu.memory_space<smem>>
    %129 = vector.broadcast %128 : f32 to vector<14x14xf32>
    %130 = arith.mulf %129, %127 : vector<14x14xf32>
    %131 = arith.addf %116, %130 : vector<14x14xf32>
    %c36 = arith.constant 36 : index
    %132 = memref.load %arg2[%c36] : memref<81xf32, #tpu.memory_space<smem>>
    %133 = vector.broadcast %132 : f32 to vector<14x14xf32>
    %134 = arith.mulf %133, %127 : vector<14x14xf32>
    %135 = arith.addf %120, %134 : vector<14x14xf32>
    %c63 = arith.constant 63 : index
    %136 = memref.load %arg2[%c63] : memref<81xf32, #tpu.memory_space<smem>>
    %137 = vector.broadcast %136 : f32 to vector<14x14xf32>
    %138 = arith.mulf %137, %127 : vector<14x14xf32>
    %139 = arith.addf %124, %138 : vector<14x14xf32>
    %140 = vector.extract_strided_slice %126 {offsets = [0, 1], sizes = [14, 14], strides = [1, 1]} : vector<16x16xf32> to vector<14x14xf32>
    %c10 = arith.constant 10 : index
    %141 = memref.load %arg2[%c10] : memref<81xf32, #tpu.memory_space<smem>>
    %142 = vector.broadcast %141 : f32 to vector<14x14xf32>
    %143 = arith.mulf %142, %140 : vector<14x14xf32>
    %144 = arith.addf %131, %143 : vector<14x14xf32>
    %c37 = arith.constant 37 : index
    %145 = memref.load %arg2[%c37] : memref<81xf32, #tpu.memory_space<smem>>
    %146 = vector.broadcast %145 : f32 to vector<14x14xf32>
    %147 = arith.mulf %146, %140 : vector<14x14xf32>
    %148 = arith.addf %135, %147 : vector<14x14xf32>
    %c64 = arith.constant 64 : index
    %149 = memref.load %arg2[%c64] : memref<81xf32, #tpu.memory_space<smem>>
    %150 = vector.broadcast %149 : f32 to vector<14x14xf32>
    %151 = arith.mulf %150, %140 : vector<14x14xf32>
    %152 = arith.addf %139, %151 : vector<14x14xf32>
    %153 = vector.extract_strided_slice %126 {offsets = [0, 2], sizes = [14, 14], strides = [1, 1]} : vector<16x16xf32> to vector<14x14xf32>
    %c11 = arith.constant 11 : index
    %154 = memref.load %arg2[%c11] : memref<81xf32, #tpu.memory_space<smem>>
    %155 = vector.broadcast %154 : f32 to vector<14x14xf32>
    %156 = arith.mulf %155, %153 : vector<14x14xf32>
    %157 = arith.addf %144, %156 : vector<14x14xf32>
    %c38 = arith.constant 38 : index
    %158 = memref.load %arg2[%c38] : memref<81xf32, #tpu.memory_space<smem>>
    %159 = vector.broadcast %158 : f32 to vector<14x14xf32>
    %160 = arith.mulf %159, %153 : vector<14x14xf32>
    %161 = arith.addf %148, %160 : vector<14x14xf32>
    %c65 = arith.constant 65 : index
    %162 = memref.load %arg2[%c65] : memref<81xf32, #tpu.memory_space<smem>>
    %163 = vector.broadcast %162 : f32 to vector<14x14xf32>
    %164 = arith.mulf %163, %153 : vector<14x14xf32>
    %165 = arith.addf %152, %164 : vector<14x14xf32>
    %166 = vector.extract_strided_slice %126 {offsets = [1, 0], sizes = [14, 14], strides = [1, 1]} : vector<16x16xf32> to vector<14x14xf32>
    %c12 = arith.constant 12 : index
    %167 = memref.load %arg2[%c12] : memref<81xf32, #tpu.memory_space<smem>>
    %168 = vector.broadcast %167 : f32 to vector<14x14xf32>
    %169 = arith.mulf %168, %166 : vector<14x14xf32>
    %170 = arith.addf %157, %169 : vector<14x14xf32>
    %c39 = arith.constant 39 : index
    %171 = memref.load %arg2[%c39] : memref<81xf32, #tpu.memory_space<smem>>
    %172 = vector.broadcast %171 : f32 to vector<14x14xf32>
    %173 = arith.mulf %172, %166 : vector<14x14xf32>
    %174 = arith.addf %161, %173 : vector<14x14xf32>
    %c66 = arith.constant 66 : index
    %175 = memref.load %arg2[%c66] : memref<81xf32, #tpu.memory_space<smem>>
    %176 = vector.broadcast %175 : f32 to vector<14x14xf32>
    %177 = arith.mulf %176, %166 : vector<14x14xf32>
    %178 = arith.addf %165, %177 : vector<14x14xf32>
    %179 = vector.extract_strided_slice %126 {offsets = [1, 1], sizes = [14, 14], strides = [1, 1]} : vector<16x16xf32> to vector<14x14xf32>
    %c13 = arith.constant 13 : index
    %180 = memref.load %arg2[%c13] : memref<81xf32, #tpu.memory_space<smem>>
    %181 = vector.broadcast %180 : f32 to vector<14x14xf32>
    %182 = arith.mulf %181, %179 : vector<14x14xf32>
    %183 = arith.addf %170, %182 : vector<14x14xf32>
    %c40 = arith.constant 40 : index
    %184 = memref.load %arg2[%c40] : memref<81xf32, #tpu.memory_space<smem>>
    %185 = vector.broadcast %184 : f32 to vector<14x14xf32>
    %186 = arith.mulf %185, %179 : vector<14x14xf32>
    %187 = arith.addf %174, %186 : vector<14x14xf32>
    %c67 = arith.constant 67 : index
    %188 = memref.load %arg2[%c67] : memref<81xf32, #tpu.memory_space<smem>>
    %189 = vector.broadcast %188 : f32 to vector<14x14xf32>
    %190 = arith.mulf %189, %179 : vector<14x14xf32>
    %191 = arith.addf %178, %190 : vector<14x14xf32>
    %192 = vector.extract_strided_slice %126 {offsets = [1, 2], sizes = [14, 14], strides = [1, 1]} : vector<16x16xf32> to vector<14x14xf32>
    %c14 = arith.constant 14 : index
    %193 = memref.load %arg2[%c14] : memref<81xf32, #tpu.memory_space<smem>>
    %194 = vector.broadcast %193 : f32 to vector<14x14xf32>
    %195 = arith.mulf %194, %192 : vector<14x14xf32>
    %196 = arith.addf %183, %195 : vector<14x14xf32>
    %c41 = arith.constant 41 : index
    %197 = memref.load %arg2[%c41] : memref<81xf32, #tpu.memory_space<smem>>
    %198 = vector.broadcast %197 : f32 to vector<14x14xf32>
    %199 = arith.mulf %198, %192 : vector<14x14xf32>
    %200 = arith.addf %187, %199 : vector<14x14xf32>
    %c68 = arith.constant 68 : index
    %201 = memref.load %arg2[%c68] : memref<81xf32, #tpu.memory_space<smem>>
    %202 = vector.broadcast %201 : f32 to vector<14x14xf32>
    %203 = arith.mulf %202, %192 : vector<14x14xf32>
    %204 = arith.addf %191, %203 : vector<14x14xf32>
    %205 = vector.extract_strided_slice %126 {offsets = [2, 0], sizes = [14, 14], strides = [1, 1]} : vector<16x16xf32> to vector<14x14xf32>
    %c15 = arith.constant 15 : index
    %206 = memref.load %arg2[%c15] : memref<81xf32, #tpu.memory_space<smem>>
    %207 = vector.broadcast %206 : f32 to vector<14x14xf32>
    %208 = arith.mulf %207, %205 : vector<14x14xf32>
    %209 = arith.addf %196, %208 : vector<14x14xf32>
    %c42 = arith.constant 42 : index
    %210 = memref.load %arg2[%c42] : memref<81xf32, #tpu.memory_space<smem>>
    %211 = vector.broadcast %210 : f32 to vector<14x14xf32>
    %212 = arith.mulf %211, %205 : vector<14x14xf32>
    %213 = arith.addf %200, %212 : vector<14x14xf32>
    %c69 = arith.constant 69 : index
    %214 = memref.load %arg2[%c69] : memref<81xf32, #tpu.memory_space<smem>>
    %215 = vector.broadcast %214 : f32 to vector<14x14xf32>
    %216 = arith.mulf %215, %205 : vector<14x14xf32>
    %217 = arith.addf %204, %216 : vector<14x14xf32>
    %218 = vector.extract_strided_slice %126 {offsets = [2, 1], sizes = [14, 14], strides = [1, 1]} : vector<16x16xf32> to vector<14x14xf32>
    %c16 = arith.constant 16 : index
    %219 = memref.load %arg2[%c16] : memref<81xf32, #tpu.memory_space<smem>>
    %220 = vector.broadcast %219 : f32 to vector<14x14xf32>
    %221 = arith.mulf %220, %218 : vector<14x14xf32>
    %222 = arith.addf %209, %221 : vector<14x14xf32>
    %c43 = arith.constant 43 : index
    %223 = memref.load %arg2[%c43] : memref<81xf32, #tpu.memory_space<smem>>
    %224 = vector.broadcast %223 : f32 to vector<14x14xf32>
    %225 = arith.mulf %224, %218 : vector<14x14xf32>
    %226 = arith.addf %213, %225 : vector<14x14xf32>
    %c70 = arith.constant 70 : index
    %227 = memref.load %arg2[%c70] : memref<81xf32, #tpu.memory_space<smem>>
    %228 = vector.broadcast %227 : f32 to vector<14x14xf32>
    %229 = arith.mulf %228, %218 : vector<14x14xf32>
    %230 = arith.addf %217, %229 : vector<14x14xf32>
    %231 = vector.extract_strided_slice %126 {offsets = [2, 2], sizes = [14, 14], strides = [1, 1]} : vector<16x16xf32> to vector<14x14xf32>
    %c17 = arith.constant 17 : index
    %232 = memref.load %arg2[%c17] : memref<81xf32, #tpu.memory_space<smem>>
    %233 = vector.broadcast %232 : f32 to vector<14x14xf32>
    %234 = arith.mulf %233, %231 : vector<14x14xf32>
    %235 = arith.addf %222, %234 : vector<14x14xf32>
    %c44 = arith.constant 44 : index
    %236 = memref.load %arg2[%c44] : memref<81xf32, #tpu.memory_space<smem>>
    %237 = vector.broadcast %236 : f32 to vector<14x14xf32>
    %238 = arith.mulf %237, %231 : vector<14x14xf32>
    %239 = arith.addf %226, %238 : vector<14x14xf32>
    %c71 = arith.constant 71 : index
    %240 = memref.load %arg2[%c71] : memref<81xf32, #tpu.memory_space<smem>>
    %241 = vector.broadcast %240 : f32 to vector<14x14xf32>
    %242 = arith.mulf %241, %231 : vector<14x14xf32>
    %243 = arith.addf %230, %242 : vector<14x14xf32>
    %c0_11 = arith.constant 0 : index
    %c2_12 = arith.constant 2 : index
    %c0_13 = arith.constant 0 : index
    %c0_14 = arith.constant 0 : index
    %244 = vector.load %arg1[%c0_11, %c2_12, %c0_13, %c0_14] : memref<1x3x16x16xf32, #tpu.memory_space<vmem>>, vector<1x1x16x16xf32>
    %245 = vector.shape_cast %244 : vector<1x1x16x16xf32> to vector<16x16xf32>
    %246 = vector.extract_strided_slice %245 {offsets = [0, 0], sizes = [14, 14], strides = [1, 1]} : vector<16x16xf32> to vector<14x14xf32>
    %c18 = arith.constant 18 : index
    %247 = memref.load %arg2[%c18] : memref<81xf32, #tpu.memory_space<smem>>
    %248 = vector.broadcast %247 : f32 to vector<14x14xf32>
    %249 = arith.mulf %248, %246 : vector<14x14xf32>
    %250 = arith.addf %235, %249 : vector<14x14xf32>
    %c45 = arith.constant 45 : index
    %251 = memref.load %arg2[%c45] : memref<81xf32, #tpu.memory_space<smem>>
    %252 = vector.broadcast %251 : f32 to vector<14x14xf32>
    %253 = arith.mulf %252, %246 : vector<14x14xf32>
    %254 = arith.addf %239, %253 : vector<14x14xf32>
    %c72 = arith.constant 72 : index
    %255 = memref.load %arg2[%c72] : memref<81xf32, #tpu.memory_space<smem>>
    %256 = vector.broadcast %255 : f32 to vector<14x14xf32>
    %257 = arith.mulf %256, %246 : vector<14x14xf32>
    %258 = arith.addf %243, %257 : vector<14x14xf32>
    %259 = vector.extract_strided_slice %245 {offsets = [0, 1], sizes = [14, 14], strides = [1, 1]} : vector<16x16xf32> to vector<14x14xf32>
    %c19 = arith.constant 19 : index
    %260 = memref.load %arg2[%c19] : memref<81xf32, #tpu.memory_space<smem>>
    %261 = vector.broadcast %260 : f32 to vector<14x14xf32>
    %262 = arith.mulf %261, %259 : vector<14x14xf32>
    %263 = arith.addf %250, %262 : vector<14x14xf32>
    %c46 = arith.constant 46 : index
    %264 = memref.load %arg2[%c46] : memref<81xf32, #tpu.memory_space<smem>>
    %265 = vector.broadcast %264 : f32 to vector<14x14xf32>
    %266 = arith.mulf %265, %259 : vector<14x14xf32>
    %267 = arith.addf %254, %266 : vector<14x14xf32>
    %c73 = arith.constant 73 : index
    %268 = memref.load %arg2[%c73] : memref<81xf32, #tpu.memory_space<smem>>
    %269 = vector.broadcast %268 : f32 to vector<14x14xf32>
    %270 = arith.mulf %269, %259 : vector<14x14xf32>
    %271 = arith.addf %258, %270 : vector<14x14xf32>
    %272 = vector.extract_strided_slice %245 {offsets = [0, 2], sizes = [14, 14], strides = [1, 1]} : vector<16x16xf32> to vector<14x14xf32>
    %c20 = arith.constant 20 : index
    %273 = memref.load %arg2[%c20] : memref<81xf32, #tpu.memory_space<smem>>
    %274 = vector.broadcast %273 : f32 to vector<14x14xf32>
    %275 = arith.mulf %274, %272 : vector<14x14xf32>
    %276 = arith.addf %263, %275 : vector<14x14xf32>
    %c47 = arith.constant 47 : index
    %277 = memref.load %arg2[%c47] : memref<81xf32, #tpu.memory_space<smem>>
    %278 = vector.broadcast %277 : f32 to vector<14x14xf32>
    %279 = arith.mulf %278, %272 : vector<14x14xf32>
    %280 = arith.addf %267, %279 : vector<14x14xf32>
    %c74 = arith.constant 74 : index
    %281 = memref.load %arg2[%c74] : memref<81xf32, #tpu.memory_space<smem>>
    %282 = vector.broadcast %281 : f32 to vector<14x14xf32>
    %283 = arith.mulf %282, %272 : vector<14x14xf32>
    %284 = arith.addf %271, %283 : vector<14x14xf32>
    %285 = vector.extract_strided_slice %245 {offsets = [1, 0], sizes = [14, 14], strides = [1, 1]} : vector<16x16xf32> to vector<14x14xf32>
    %c21 = arith.constant 21 : index
    %286 = memref.load %arg2[%c21] : memref<81xf32, #tpu.memory_space<smem>>
    %287 = vector.broadcast %286 : f32 to vector<14x14xf32>
    %288 = arith.mulf %287, %285 : vector<14x14xf32>
    %289 = arith.addf %276, %288 : vector<14x14xf32>
    %c48 = arith.constant 48 : index
    %290 = memref.load %arg2[%c48] : memref<81xf32, #tpu.memory_space<smem>>
    %291 = vector.broadcast %290 : f32 to vector<14x14xf32>
    %292 = arith.mulf %291, %285 : vector<14x14xf32>
    %293 = arith.addf %280, %292 : vector<14x14xf32>
    %c75 = arith.constant 75 : index
    %294 = memref.load %arg2[%c75] : memref<81xf32, #tpu.memory_space<smem>>
    %295 = vector.broadcast %294 : f32 to vector<14x14xf32>
    %296 = arith.mulf %295, %285 : vector<14x14xf32>
    %297 = arith.addf %284, %296 : vector<14x14xf32>
    %298 = vector.extract_strided_slice %245 {offsets = [1, 1], sizes = [14, 14], strides = [1, 1]} : vector<16x16xf32> to vector<14x14xf32>
    %c22 = arith.constant 22 : index
    %299 = memref.load %arg2[%c22] : memref<81xf32, #tpu.memory_space<smem>>
    %300 = vector.broadcast %299 : f32 to vector<14x14xf32>
    %301 = arith.mulf %300, %298 : vector<14x14xf32>
    %302 = arith.addf %289, %301 : vector<14x14xf32>
    %c49 = arith.constant 49 : index
    %303 = memref.load %arg2[%c49] : memref<81xf32, #tpu.memory_space<smem>>
    %304 = vector.broadcast %303 : f32 to vector<14x14xf32>
    %305 = arith.mulf %304, %298 : vector<14x14xf32>
    %306 = arith.addf %293, %305 : vector<14x14xf32>
    %c76 = arith.constant 76 : index
    %307 = memref.load %arg2[%c76] : memref<81xf32, #tpu.memory_space<smem>>
    %308 = vector.broadcast %307 : f32 to vector<14x14xf32>
    %309 = arith.mulf %308, %298 : vector<14x14xf32>
    %310 = arith.addf %297, %309 : vector<14x14xf32>
    %311 = vector.extract_strided_slice %245 {offsets = [1, 2], sizes = [14, 14], strides = [1, 1]} : vector<16x16xf32> to vector<14x14xf32>
    %c23 = arith.constant 23 : index
    %312 = memref.load %arg2[%c23] : memref<81xf32, #tpu.memory_space<smem>>
    %313 = vector.broadcast %312 : f32 to vector<14x14xf32>
    %314 = arith.mulf %313, %311 : vector<14x14xf32>
    %315 = arith.addf %302, %314 : vector<14x14xf32>
    %c50 = arith.constant 50 : index
    %316 = memref.load %arg2[%c50] : memref<81xf32, #tpu.memory_space<smem>>
    %317 = vector.broadcast %316 : f32 to vector<14x14xf32>
    %318 = arith.mulf %317, %311 : vector<14x14xf32>
    %319 = arith.addf %306, %318 : vector<14x14xf32>
    %c77 = arith.constant 77 : index
    %320 = memref.load %arg2[%c77] : memref<81xf32, #tpu.memory_space<smem>>
    %321 = vector.broadcast %320 : f32 to vector<14x14xf32>
    %322 = arith.mulf %321, %311 : vector<14x14xf32>
    %323 = arith.addf %310, %322 : vector<14x14xf32>
    %324 = vector.extract_strided_slice %245 {offsets = [2, 0], sizes = [14, 14], strides = [1, 1]} : vector<16x16xf32> to vector<14x14xf32>
    %c24 = arith.constant 24 : index
    %325 = memref.load %arg2[%c24] : memref<81xf32, #tpu.memory_space<smem>>
    %326 = vector.broadcast %325 : f32 to vector<14x14xf32>
    %327 = arith.mulf %326, %324 : vector<14x14xf32>
    %328 = arith.addf %315, %327 : vector<14x14xf32>
    %c51 = arith.constant 51 : index
    %329 = memref.load %arg2[%c51] : memref<81xf32, #tpu.memory_space<smem>>
    %330 = vector.broadcast %329 : f32 to vector<14x14xf32>
    %331 = arith.mulf %330, %324 : vector<14x14xf32>
    %332 = arith.addf %319, %331 : vector<14x14xf32>
    %c78 = arith.constant 78 : index
    %333 = memref.load %arg2[%c78] : memref<81xf32, #tpu.memory_space<smem>>
    %334 = vector.broadcast %333 : f32 to vector<14x14xf32>
    %335 = arith.mulf %334, %324 : vector<14x14xf32>
    %336 = arith.addf %323, %335 : vector<14x14xf32>
    %337 = vector.extract_strided_slice %245 {offsets = [2, 1], sizes = [14, 14], strides = [1, 1]} : vector<16x16xf32> to vector<14x14xf32>
    %c25 = arith.constant 25 : index
    %338 = memref.load %arg2[%c25] : memref<81xf32, #tpu.memory_space<smem>>
    %339 = vector.broadcast %338 : f32 to vector<14x14xf32>
    %340 = arith.mulf %339, %337 : vector<14x14xf32>
    %341 = arith.addf %328, %340 : vector<14x14xf32>
    %c52 = arith.constant 52 : index
    %342 = memref.load %arg2[%c52] : memref<81xf32, #tpu.memory_space<smem>>
    %343 = vector.broadcast %342 : f32 to vector<14x14xf32>
    %344 = arith.mulf %343, %337 : vector<14x14xf32>
    %345 = arith.addf %332, %344 : vector<14x14xf32>
    %c79 = arith.constant 79 : index
    %346 = memref.load %arg2[%c79] : memref<81xf32, #tpu.memory_space<smem>>
    %347 = vector.broadcast %346 : f32 to vector<14x14xf32>
    %348 = arith.mulf %347, %337 : vector<14x14xf32>
    %349 = arith.addf %336, %348 : vector<14x14xf32>
    %350 = vector.extract_strided_slice %245 {offsets = [2, 2], sizes = [14, 14], strides = [1, 1]} : vector<16x16xf32> to vector<14x14xf32>
    %c26 = arith.constant 26 : index
    %351 = memref.load %arg2[%c26] : memref<81xf32, #tpu.memory_space<smem>>
    %352 = vector.broadcast %351 : f32 to vector<14x14xf32>
    %353 = arith.mulf %352, %350 : vector<14x14xf32>
    %354 = arith.addf %341, %353 : vector<14x14xf32>
    %c53 = arith.constant 53 : index
    %355 = memref.load %arg2[%c53] : memref<81xf32, #tpu.memory_space<smem>>
    %356 = vector.broadcast %355 : f32 to vector<14x14xf32>
    %357 = arith.mulf %356, %350 : vector<14x14xf32>
    %358 = arith.addf %345, %357 : vector<14x14xf32>
    %c80 = arith.constant 80 : index
    %359 = memref.load %arg2[%c80] : memref<81xf32, #tpu.memory_space<smem>>
    %360 = vector.broadcast %359 : f32 to vector<14x14xf32>
    %361 = arith.mulf %360, %350 : vector<14x14xf32>
    %362 = arith.addf %349, %361 : vector<14x14xf32>
    %cst = arith.constant 0.000000e+00 : f32
    %363 = vector.broadcast %cst : f32 to vector<14x14xf32>
    %364 = arith.maximumf %354, %363 : vector<14x14xf32>
    %c0_15 = arith.constant 0 : index
    %c0_16 = arith.constant 0 : index
    %c0_17 = arith.constant 0 : index
    %c0_18 = arith.constant 0 : index
    %365 = vector.load %arg4[%c0_15, %c0_16, %c0_17, %c0_18] : memref<1x3x14x14xf32, #tpu.memory_space<vmem>>, vector<1x1x14x14xf32>
    %366 = vector.shape_cast %365 : vector<1x1x14x14xf32> to vector<14x14xf32>
    %367 = vector.shape_cast %364 : vector<14x14xf32> to vector<1x1x14x14xf32>
    tpu.vector_store %arg4[%c0_15, %c0_16, %c0_17, %c0_18], %367 {strides = array<i32>} : memref<1x3x14x14xf32, #tpu.memory_space<vmem>>, vector<1x1x14x14xf32>,
    %cst_19 = arith.constant 0.000000e+00 : f32
    %368 = vector.broadcast %cst_19 : f32 to vector<14x14xf32>
    %369 = arith.maximumf %358, %368 : vector<14x14xf32>
    %c0_20 = arith.constant 0 : index
    %c1_21 = arith.constant 1 : index
    %c0_22 = arith.constant 0 : index
    %c0_23 = arith.constant 0 : index
    %370 = vector.load %arg4[%c0_20, %c1_21, %c0_22, %c0_23] : memref<1x3x14x14xf32, #tpu.memory_space<vmem>>, vector<1x1x14x14xf32>
    %371 = vector.shape_cast %370 : vector<1x1x14x14xf32> to vector<14x14xf32>
    %372 = vector.shape_cast %369 : vector<14x14xf32> to vector<1x1x14x14xf32>
    tpu.vector_store %arg4[%c0_20, %c1_21, %c0_22, %c0_23], %372 {strides = array<i32>} : memref<1x3x14x14xf32, #tpu.memory_space<vmem>>, vector<1x1x14x14xf32>,
    %cst_24 = arith.constant 0.000000e+00 : f32
    %373 = vector.broadcast %cst_24 : f32 to vector<14x14xf32>
    %374 = arith.maximumf %362, %373 : vector<14x14xf32>
    %c0_25 = arith.constant 0 : index
    %c2_26 = arith.constant 2 : index
    %c0_27 = arith.constant 0 : index
    %c0_28 = arith.constant 0 : index
    %375 = vector.load %arg4[%c0_25, %c2_26, %c0_27, %c0_28] : memref<1x3x14x14xf32, #tpu.memory_space<vmem>>, vector<1x1x14x14xf32>
    %376 = vector.shape_cast %375 : vector<1x1x14x14xf32> to vector<14x14xf32>
    %377 = vector.shape_cast %374 : vector<14x14xf32> to vector<1x1x14x14xf32>
    tpu.vector_store %arg4[%c0_25, %c2_26, %c0_27, %c0_28], %377 {strides = array<i32>} : memref<1x3x14x14xf32, #tpu.memory_space<vmem>>, vector<1x1x14x14xf32>,
    return
  }
  func.func @transform_0(%arg0: i32) -> (i32, i32, i32, i32) {
    %c0_i32 = arith.constant 0 : i32
    %c0_i32_0 = arith.constant 0 : i32
    %c0_i32_1 = arith.constant 0 : i32
    %c0_i32_2 = arith.constant 0 : i32
    return %arg0, %c0_i32, %c0_i32_0, %c0_i32_1 : i32, i32, i32, i32
  }
  func.func @transform_1(%arg0: i32) -> i32 {
    %c0_i32 = arith.constant 0 : i32
    %c0_i32_0 = arith.constant 0 : i32
    return %c0_i32 : i32
  }
  func.func @transform_2(%arg0: i32) -> i32 {
    %c0_i32 = arith.constant 0 : i32
    %c0_i32_0 = arith.constant 0 : i32
    return %c0_i32 : i32
  }
  func.func @transform_3(%arg0: i32) -> (i32, i32, i32, i32) {
    %c0_i32 = arith.constant 0 : i32
    %c0_i32_0 = arith.constant 0 : i32
    %c0_i32_1 = arith.constant 0 : i32
    %c0_i32_2 = arith.constant 0 : i32
    return %arg0, %c0_i32, %c0_i32_0, %c0_i32_1 : i32, i32, i32, i32
  }
}

</mosaic_0001>

<bundles_post_ra>
// kernel: tpu_custom_call.1
= control target key start
LH: loop header
LB: loop body
LE: loop exit
PB: predicated region body
PF: predicated region fallthrough
CT: control target
= control target key end

     0   :  { %8 = vsyncpa [#allocation3], 0  ;;  %s2593_s0 = inlined_call_operand.hbm [shape: f32[2,3,16,16], index: 0, kind: input, shape index: {}]   ;;  %s2594_s1 = inlined_call_operand.vmem [shape: f32[81], index: 1, kind: input, shape index: {}]   ;;  %s2595_s2 = inlined_call_operand.vmem [shape: f32[3], index: 2, kind: input, shape index: {}]   ;;  %s2596_s3 = inlined_call_operand.vmem [shape: f32[2,3,14,14], index: 3, kind: output, shape index: {}]  }
   0x1   :  { %10 = vsyncpa [#allocation3 + $0x1], 0 }
   0x2   :  { %11 = vsyncpa [#allocation4], 0 }
   0x3   :  { %12 = vsyncpa [#allocation7], 0  ;;  %s1792_s12 = smov 0   ;;  %s1794_s13 = smov 0  }
   0x4   :  { %s1796_s14 = smov 0   ;;  %s1798_s15 = smov 0  }
   0x5 LB: > { %s1811_s16 = sadd.s32 4294967295, %s1763_s15   ;;  %s1814_s17 = sadd.s32 1, %s1763_s15   ;;  %s1763_s15 = sphi %s1798_s15, %s2616_s15   ;;  %s1759_s14 = sphi %s1796_s14, %s2615_s14   ;;  %s1755_s13 = sphi %s1794_s13, %s2614_s13   ;;  %s1751_s12 = sphi %s1792_s12, %s2613_s12  }
   0x6   : > { %s22_s18 = ssub.s32 %s1763_s15, %s1814_s17  ;;  %s25_s19 = sadd.s32 1, %s1759_s14 }
   0x7   : > { %p23_p0 = scmp.eq.s32.totalorder %s22_s18, 0  ;;  %p32_p1 = scmp.ne.s32.totalorder %s1759_s14, %s1755_s13 }
   0x8   : > { %p33_p2 = scmp.eq.s32.totalorder %s1763_s15, 0  ;;  %p38_p3 = scmp.ne.s32.totalorder %s1755_s13, %s1751_s12 }
   0x9   : > { %s1824_s20 = scalar_select %p23_p0, %s1759_s14, %s25_s19  }
   0xa   : > { %p1826_p4 = por %p33_p2, %p32_p1  ;;  %p2597_p5 = scmp.eq.s32.totalorder %s1811_s16, 0 }
   0xb   : > { %p1492_p6 = scmp.ge.s32.totalorder %s1763_s15, 1  ;;  %p117_p7 = scmp.lt.s32.totalorder %s1763_s15, 3 }
   0xc   : > { %p1835_p8 = por %p2597_p5, %p38_p3  ;;  %s130_s26 = sshll.u32 %s2594_s1, 4  ;;  %s131_s26 = int_to_ptr.vmem [resolvable:$true] %s130_s26 }
   0xd   : > { %p1839_p9 = pnand %p1492_p6, %p117_p7  ;;  %p1620_p11 = scmp.lt.s32.totalorder %s1763_s15, 2 }
   0xe   : > { %s2602_s22 = scalar_select %p1835_p8, 1, 0 }
   0xf   : > { %s2603_s23 = scalar_select %p1839_p9, 1, 0 }
  0x10   : > { %p1607_p10 = pneg %p1839_p9  ;;  %s141_s29 = sshll.u32 %s2595_s2, 4  ;;  %s142_s29 = int_to_ptr.vmem [resolvable:$true] %s141_s29 }
  0x11   : > { %p1860_p13 = pnand %p1620_p11, %p1826_p4  ;;  %s152_s5 = sand.u32 1, %s1759_s14  }
  0x12   : > { %p1854_p12 = pnand %p1607_p10, %p2597_p5  ;;  %s1661_s6 = scalar_lea.vmem %s131_s26, 16 }
  0x13   : > { %s2605_s4 = scalar_select %p1860_p13, 1, 0 }
  0x14   : > { %p1662_p0 = scmp.ne.s32.totalorder %s131_s26, %s1661_s6  ;;  %p1663_p1 = pneg %p1854_p12 }
  0x15   : > { %p1669_p6 = scmp.lt.s32.totalorder %s131_s26, %s131_s26  ;;  %p1670_p7 = scmp.lt.s32.totalorder %s1661_s6, %s1661_s6 }
  0x16   : > { %p1664_p2 = pnand %p1663_p1, %p1662_p0 }
  0x17   : > { %p1671_p10 = por %p1670_p7, %p1669_p6 }
  0x18   : > { %p1665_p3 = pneg %p1664_p2 }
  0x1a   : > { %p1672_p5 = pnand %p1671_p10, %p1665_p3 }
  0x1c   : > { %1675 = shalt.err (!%p1672_p5)
}
  0x1d   : > { %s1765_s7 = smov [#allocation5]   ;;  %s1676_s8 = scalar_lea.vmem %s142_s29, 16 }
  0x1e   : > { %1610 = dma.vmem_to_smem (!%p1854_p12), %s131_s26, 16, %s1765_s7, [#allocation4]  }
  0x1f   : > { %p1677_p4 = scmp.ne.s32.totalorder %s142_s29, %s1676_s8  ;;  %p1684_p9 = scmp.lt.s32.totalorder %s142_s29, %s142_s29 }
  0x20   : > { %p1685_p13 = scmp.lt.s32.totalorder %s1676_s8, %s1676_s8 }
  0x21   : > { %p1679_p11 = pnand %p1677_p4, %p1663_p1 }
  0x22   : > { %p1686_p0 = por %p1685_p13, %p1684_p9 }
  0x23   : > { %p1680_p8 = pneg %p1679_p11 }
  0x25   : > { %p1687_p2 = pnand %p1686_p0, %p1680_p8 }
  0x27   : > { %1690 = shalt.err (!%p1687_p2)
}
  0x28   : > { %s1766_s9 = smov [#allocation6]   ;;  %s1593_s10 = smul.u32 48, %s152_s5 }
  0x29   : > { %1613 = dma.vmem_to_smem (!%p1854_p12), %s142_s29, 16, %s1766_s9, [#allocation7]  }
  0x2a   : > { %s1594_s11 = smul.u32 768, %s1763_s15  ;;  %s156_s21 = scalar_lea.vmem [#allocation2], %s1593_s10 }
  0x2b   : > { %s163_s24 = sshll.u32 %s156_s21, 4  ;;  %s1883_s25 = scalar_lea.sflag [#allocation3], %s152_s5  ;;  %s1879_s24 = int_to_ptr.vmem [resolvable:$true] %s163_s24 }
  0x2c   : > { %s1877_s19 = scalar_lea.hbm %s2593_s0, %s1594_s11  ;;  %p2606_p8 = scmp.ne.s32.totalorder %s2605_s4, 0 }
  0x2d   : > { %s1691_s26 = scalar_lea.hbm %s1877_s19, 768  ;;  %s1696_s28 = scalar_lea.hbm %s2593_s0, 1536 }
  0x2e   : > { %p1692_p5 = scmp.ne.s32.totalorder %s1877_s19, %s1691_s26  ;;  %p1693_p9 = pneg %p2606_p8 }
  0x2f   : > { %p1697_p1 = scmp.lt.u32.totalorder %s1877_s19, %s2593_s0  ;;  %p1698_p3 = scmp.lt.u32.totalorder %s1696_s28, %s1691_s26 }
  0x30   : > { %p1694_p12 = pnand %p1693_p9, %p1692_p5  ;;  %p1700_p7 = scmp.lt.u32.totalorder %s1691_s26, %s1877_s19 }
  0x31   : > { %p1699_p6 = por %p1698_p3, %p1697_p1 }
  0x32   : > { %p1695_p13 = pneg %p1694_p12 }
  0x33   : > { %p1701_p10 = por %p1700_p7, %p1699_p6 }
  0x35   : > { %p1702_p4 = pnand %p1701_p10, %p1695_p13 }
  0x37   : > { %1705 = shalt.err (!%p1702_p4)
}
  0x38   : > { %s1706_s5 = scalar_lea.vmem %s1879_s24, 768  ;;  %s1767_s6 = smov [#allocation2]  }
  0x39   : > { %p1707_p11 = scmp.ne.s32.totalorder %s1879_s24, %s1706_s5  ;;  %s1711_s7 = sshll.u32 %s1767_s6, 4  ;;  %s1712_s7 = int_to_ptr.vmem [resolvable:$false] %s1711_s7 }
  0x3a   : > { %s1713_s8 = scalar_lea.vmem %s1712_s7, 1536  ;;  %p1714_p5 = scmp.lt.s32.totalorder %s1879_s24, %s1712_s7 }
  0x3b   : > { %p1709_p0 = pnand %p1707_p11, %p1693_p9  ;;  %p1715_p12 = scmp.lt.s32.totalorder %s1713_s8, %s1706_s5 }
  0x3d   : > { %p1710_p2 = pneg %p1709_p0  ;;  %p1716_p1 = por %p1715_p12, %p1714_p5 }
  0x3f   : > { %p1717_p3 = pnand %p1716_p1, %p1710_p2 }
  0x41   : > { %1720 = shalt.err (!%p1717_p3)
}
  0x42   : > { %s1768_s9 = smov 128   ;;  %s1769_s10 = smov 8  }
  0x43   : > { %1617 = dma.hbm_to_vmem [thread:$0]  (!%p2606_p8), %s1877_s19, 768, %s1879_s24, %s1883_s25, %s1768_s9, %s1768_s9, %s1769_s10  }
  0x44   : > { %p2607_p9 = scmp.ne.s32.totalorder %s2603_s23, 0 }
  0x45   : > { %s177_s11 = sand.u32 (!%p2607_p9), 1, %s1755_s13   ;;  %p2608_p13 = scmp.ne.s32.totalorder (!%p2607_p9), %s2602_s22, 0 }
  0x46   : > { %175 = sbr.rel (%p2607_p9) target bundleno = 429 (0x1ad), region = 32  ;;  %s178_s18 = scalar_lea.sflag (!%p2607_p9), [#allocation3], %s177_s11 }
  0x47   : > { %s1595_s12 = smul.u32 (!%p2607_p9), 48, %s177_s11 }
  0x49   : > { %s1914_s21 = scalar_lea.vmem (!%p2607_p9), [#allocation2], %s1595_s12 }
  0x4d   : > { %1738 = dma.done.wait (%p2608_p13), %s178_s18, 768  }
  0x4e   : > { %1740 = vsyncadd (%p2608_p13), %s178_s18, 4294966528  ;;  %p2609_p6 = scmp.eq.s32.totalorder %s1811_s16, 0 }
  0x50   : > { %1742 = dma.done.wait (%p2609_p6), [#allocation4], 16   ;;  %p2610_p8 = pmov %p2609_p6 }
  0x51   : > { %p2611_p7 = pmov %p2609_p6 }
  0x52   : > { %1744 = vsyncadd (%p2610_p8), [#allocation4], 4294967280 }
  0x53   : > { %1746 = dma.done.wait (%p2611_p7), [#allocation7], 16   ;;  %p2612_p10 = pmov %p2609_p6 }
  0x55   : > { %1748 = vsyncadd (%p2612_p10), [#allocation7], 4294967280 }
  0x56   : > { %194 = sfence }
  0x57   : > { %s1506_s23 = sld [smem:[#allocation5 + $0x1c]]  ;;  %s1505_s4 = sld [smem:[#allocation5 + $0x1]]  ;;  %v1929_v0 = vld [vmem:[%s1914_s21] sm:$0xff]  ;;  %v1932_v1 = vld [vmem:[%s1914_s21 + $0x8] sm:$0xff]  ;;  %vm334_vm0 = vcmask 1046528   ;;  %vm476_vm1 = vcmask 1045504  }
  0x58   : > { %s1507_s19 = sld [smem:[#allocation5 + $0x37]]  ;;  %s1508_s22 = sld [smem:[#allocation5 + $0x2]]  ;;  %vm1390_vm2 = vcmask 111616   ;;  %vm1388_vm3 = vcmask 113664  }
  0x59   : > { %s1770_s24 = smov 127   ;;  %s1509_s25 = sld [smem:[#allocation5 + $0x1d]] }
  0x5a   : > { %s1514_s26 = sld [smem:[#allocation5 + $0x4]]  ;;  %s1510_s15 = sld [smem:[#allocation5 + $0x38]] }
  0x5b   : > { %s1515_s27 = sld [smem:[#allocation5 + $0x1f]]  ;;  %s1516_s28 = sld [smem:[#allocation5 + $0x3a]] }
  0x5c   : > { %s1771_s29 = smov 126   ;;  %s1952_s30 = sld [smem:[#allocation5 + $0x5]] }
  0x5d   : > { %v259_v2 = vstv %s1506_s23  ;;  %v245_v4 = vstv %s1505_s4  ;;  %s1518_s5 = sld [smem:[#allocation5 + $0x20]]  ;;  %s1519_s6 = sld [smem:[#allocation5 + $0x3b]] }
  0x5e   : > { %v260_v3 = vmul.f32 %v259_v2, %v1929_v0  ;;  %v246_v5 = vmul.f32 %v245_v4, %v1929_v0  ;;  %v261_v6 = vmul.f32 %v259_v2, %v1932_v1  ;;  %v247_v7 = vmul.f32 %v245_v4, %v1932_v1  ;;  %s1523_s7 = sld [smem:[#allocation5 + $0x7]]  ;;  %s1524_s8 = sld [smem:[#allocation5 + $0x22]] }
  0x5f   : > { %v273_v8 = vstv %s1507_s19  ;;  %v287_v11 = vstv %s1508_s22  ;;  %v301_v14 = vstv %s1509_s25  ;;  %s1983_s9 = sld [smem:[#allocation5 + $0x3d]]  ;;  %s1986_s10 = sld [smem:[#allocation5 + $0x3]] }
  0x60   : > { %264 = vrot.lane.b32.xlu1 %v260_v3, %s1770_s24  ;;  %250 = vrot.lane.b32.xlu0 %v246_v5, %s1770_s24  ;;  %v275_v9 = vmul.f32 %v273_v8, %v1932_v1  ;;  %v274_v10 = vmul.f32 %v273_v8, %v1929_v0  ;;  %v289_v12 = vmul.f32 %v287_v11, %v1932_v1  ;;  %v369_v15 = vstv %s1514_s26  ;;  %s1991_s11 = sld [smem:[#allocation5 + $0x8]]  ;;  %s1994_s12 = sld [smem:[#allocation5 + $0x1e]] }
  0x61   : > { %v288_v13 = vmul.f32 %v287_v11, %v1929_v0  ;;  %v303_v16 = vmul.f32 %v301_v14, %v1932_v1  ;;  %v302_v17 = vmul.f32 %v301_v14, %v1929_v0  ;;  %v315_v18 = vstv %s1510_s15  ;;  %s2002_s18 = sld [smem:[#allocation5 + $0x23]]  ;;  %s2004_s23 = sld [smem:[#allocation5 + $0x39]] }
  0x62   : > { %v370_v19 = vmul.f32 %v369_v15, %v1929_v0  ;;  %v371_v20 = vmul.f32 %v369_v15, %v1932_v1  ;;  %v386_v21 = vstv %s1515_s27  ;;  %v317_v22 = vmul.f32 %v315_v18, %v1932_v1  ;;  %s2007_s4 = sld [smem:[#allocation5 + $0x3e]]  ;;  %s2032_s22 = sld [smem:[#allocation5 + $0x21]] }
  0x63   : > { %v316_v23 = vmul.f32 %v315_v18, %v1929_v0  ;;  %v388_v24 = vmul.f32 %v386_v21, %v1932_v1  ;;  %v387_v27 = vmul.f32 %v386_v21, %v1929_v0  ;;  %v403_v28 = vstv %s1516_s28  ;;  %s2020_s19 = sld [smem:[#allocation5 + $0x6]]  ;;  %s2048_s25 = sld [smem:[#allocation5 + $0x3c]] }
  0x64   : > { %266 = vrot.lane.b32.xlu1 %v261_v6, %s1770_s24  ;;  %252 = vrot.lane.b32.xlu0 %v247_v7, %s1770_s24  ;;  %v375_v25 = vrot.slane %v371_v20, 1  ;;  %v374_v26 = vrot.slane %v370_v19, 1  ;;  %v420_v30 = vstv %s1952_s30  ;;  %v404_v33 = vmul.f32 %v403_v28, %v1929_v0  ;;  %s2072_s26 = sld [smem:[#allocation5 + $0xa]]  ;;  %s1535_s15 = sld [smem:[#allocation5 + $0x25]] }
  0x65   : > { %v392_v29 = vrot.slane %v388_v24, 1  ;;  %v391_v32 = vrot.slane %v387_v27, 1  ;;  %v405_v34 = vmul.f32 %v403_v28, %v1932_v1  ;;  %v421_v35 = vmul.f32 %v420_v30, %v1929_v0  ;;  %s1536_s27 = sld [smem:[#allocation5 + $0x40]]  ;;  %s1537_s28 = sld [smem:[#allocation5 + $0xb]] }
  0x66   : > { %v376_v31 = vsel %vm334_vm0, %v374_v26, %v375_v25  ;;  %v437_v36 = vstv %s1518_s5  ;;  %v408_v39 = vrot.slane %v404_v33, 1  ;;  %v422_v40 = vmul.f32 %v420_v30, %v1932_v1  ;;  %s1538_s30 = sld [smem:[#allocation5 + $0x26]]  ;;  %s1543_s5 = sld [smem:[#allocation5 + $0xd]] }
  0x67   : > { %v393_v37 = vsel %vm334_vm0, %v391_v32, %v392_v29  ;;  %v409_v38 = vrot.slane %v405_v34, 1  ;;  %v438_v41 = vmul.f32 %v437_v36, %v1929_v0  ;;  %v439_v42 = vmul.f32 %v437_v36, %v1932_v1  ;;  %p213_p4 = scmp.lt.s32.totalorder %s1811_s16, 1 }
  0x68   : > { %280 = vrot.lane.b32.xlu1 %v275_v9, %s1770_s24  ;;  %278 = vrot.lane.b32.xlu0 %v274_v10, %s1770_s24  ;;  %v426_v44 = vrot.slane %v422_v40, 1  ;;  %v425_v45 = vrot.slane %v421_v35, 1  ;;  %v454_v46 = vstv %s1519_s6  ;;  %v511_v52 = vstv %s1523_s7  ;;  %s1539_s6 = sld [smem:[#allocation5 + $0x41]]  ;;  %s1544_s7 = sld [smem:[#allocation5 + $0x28]] }
  0x69   : > { %v410_v43 = vsel %vm334_vm0, %v408_v39, %v409_v38  ;;  %v443_v47 = vrot.slane %v439_v42, 1  ;;  %v442_v48 = vrot.slane %v438_v41, 1  ;;  %v455_v50 = vmul.f32 %v454_v46, %v1929_v0  ;;  %s2618_s16 = smov (!%p213_p4, %s1811_s16), 1 }
  0x6a   : > { %v427_v49 = vsel %vm334_vm0, %v425_v45, %v426_v44  ;;  %v456_v51 = vmul.f32 %v454_v46, %v1932_v1  ;;  %v512_v54 = vmul.f32 %v511_v52, %v1929_v0  ;;  %v513_v57 = vmul.f32 %v511_v52, %v1932_v1 }
  0x6b   : > { %v444_v53 = vsel %vm334_vm0, %v442_v48, %v443_v47  ;;  %v459_v56 = vrot.slane %v455_v50, 1  ;;  %v528_v58 = vstv %s1524_s8  ;;  %v545_v2 = vstv %s1983_s9  ;;  %s1545_s8 = sld [smem:[#allocation5 + $0x43]]  ;;  %s1546_s9 = sld [smem:[#allocation5 + $0xe]] }
  0x6c   : > { %294 = vrot.lane.b32.xlu1 %v289_v12, %s1771_s29  ;;  %292 = vrot.lane.b32.xlu0 %v288_v13, %s1771_s29  ;;  %v460_v55 = vrot.slane %v456_v51, 1  ;;  %v529_v59 = vmul.f32 %v528_v58, %v1929_v0  ;;  %v530_v60 = vmul.f32 %v528_v58, %v1932_v1  ;;  %v517_v62 = vrot.slane %v513_v57, 2 }
  0x6d   : > { %v516_v63 = vrot.slane %v512_v54, 2  ;;  %v329_v3 = vstv %s1986_s10  ;;  %v546_v6 = vmul.f32 %v545_v2, %v1929_v0  ;;  %v562_v7 = vstv %s1991_s11  ;;  %s1547_s10 = sld [smem:[#allocation5 + $0x29]]  ;;  %s1548_s11 = sld [smem:[#allocation5 + $0x44]] }
  0x6e   : > { %v461_v61 = vsel %vm334_vm0, %v459_v56, %v460_v55  ;;  %v534_v4 = vrot.slane %v530_v60, 2  ;;  %v533_v5 = vrot.slane %v529_v59, 2  ;;  %v547_v9 = vmul.f32 %v545_v2, %v1932_v1  ;;  %v2106_v2 = vld [vmem:[%s1914_s21 + $0x18] sm:$0xff] }
  0x6f   : > { %v518_v8 = vsel %vm476_vm1, %v516_v63, %v517_v62  ;;  %v2016_v10 = vmul.f32 %v329_v3, %v1932_v1  ;;  %v330_v11 = vmul.f32 %v329_v3, %v1929_v0  ;;  %v343_v12 = vstv %s1994_s12  ;;  %s1552_s12 = sld [smem:[#allocation5 + $0x10]] }
  0x70   : > { %308 = vrot.lane.b32.xlu1 %v303_v16, %s1771_s29  ;;  %306 = vrot.lane.b32.xlu0 %v302_v17, %s1771_s29  ;;  %v563_v13 = vmul.f32 %v562_v7, %v1929_v0  ;;  %v535_v16 = vsel %vm476_vm1, %v533_v5, %v534_v4  ;;  %v564_v17 = vmul.f32 %v562_v7, %v1932_v1  ;;  %v551_v20 = vrot.slane %v547_v9, 2  ;;  %v2111_v5 = vld [vmem:[%s1914_s21 + $0x10] sm:$0xff] }
  0x71   : > { %v336_v14 = vrot.slane %v2016_v10, 1  ;;  %v335_v15 = vrot.slane %v330_v11, 1  ;;  %v2029_v18 = vmul.f32 %v343_v12, %v1932_v1  ;;  %v344_v19 = vmul.f32 %v343_v12, %v1929_v0 }
  0x72   : > { %v550_v21 = vrot.slane %v546_v6, 2  ;;  %v356_v26 = vstv %s2004_s23  ;;  %v596_v27 = vstv %s2007_s4  ;;  %v568_v30 = vrot.slane %v564_v17, 2  ;;  %s2165_s23 = sld [smem:[#allocation5]]  ;;  %s2170_s4 = sld [smem:[#allocation5 + $0x46]] }
  0x73   : > { %v349_v24 = vrot.slane %v2029_v18, 1  ;;  %v2045_v28 = vmul.f32 %v356_v26, %v1932_v1  ;;  %v597_v39 = vmul.f32 %v596_v27, %v1929_v0  ;;  %v485_v45 = vstv %s2032_s22  ;;  %s2176_s22 = sld [smem:[#allocation6]] }
  0x74   : > { %322 = vrot.lane.b32.xlu1 %v317_v22, %s1771_s29  ;;  %320 = vrot.lane.b32.xlu0 %v316_v23, %s1771_s29  ;;  %v579_v22 = vstv %s2002_s18  ;;  %v2038_v23 = vsel %vm334_vm0, %v335_v15, %v336_v14  ;;  %v552_v34 = vsel %vm476_vm1, %v550_v21, %v551_v20  ;;  %v2081_v51 = vmul.f32 %v485_v45, %v1932_v1  ;;  %s2161_s18 = sld [smem:[#allocation5 + $0x2b]] }
  0x75   : > { %v580_v32 = vmul.f32 %v579_v22, %v1929_v0  ;;  %v581_v35 = vmul.f32 %v579_v22, %v1932_v1  ;;  %v362_v36 = vrot.slane %v2045_v28, 1  ;;  %v601_v58 = vrot.slane %v597_v39, 2 }
  0x76   : > { %v491_v56 = vrot.slane %v2081_v51, 2  ;;  %v634_v3 = vstv %s2072_s26  ;;  %v648_v9 = vstv %s1535_s15  ;;  %v676_v17 = vstv %s1537_s28  ;;  %s2185_s26 = sld [smem:[#allocation6 + $0x1]]  ;;  %s2189_s15 = sld [smem:[#allocation5 + $0x36]] }
  0x77   : > { %v585_v46 = vrot.slane %v581_v35, 2  ;;  %v636_v7 = vmul.f32 %v2106_v2, %v634_v3  ;;  %v650_v11 = vmul.f32 %v2106_v2, %v648_v9  ;;  %v649_v12 = vmul.f32 %v2111_v5, %v648_v9  ;;  %s2201_s28 = sld [smem:[#allocation6 + $0x2]] }
  0x78   : > { %379 = vrot.lane.b32.xlu1 %v375_v25, %s1770_s24  ;;  %377 = vrot.lane.b32.xlu0 %v376_v31, %s1770_s24  ;;  %v348_v25 = vrot.slane %v344_v19, 1  ;;  %v567_v31 = vrot.slane %v563_v13, 2  ;;  %v662_v13 = vstv %s1536_s27  ;;  %v678_v19 = vmul.f32 %v2106_v2, %v676_v17  ;;  %s2197_s27 = sld [smem:[#allocation5 + $0x2c]] }
  0x79   : > { %v664_v15 = vmul.f32 %v2106_v2, %v662_v13  ;;  %v690_v21 = vstv %s1538_s30  ;;  %v757_v22 = vstv %s1543_s5  ;;  %v791_v35 = vstv %s1545_s8  ;;  %s2212_s30 = sld [smem:[#allocation5 + $0x47]]  ;;  %s2238_s5 = sld [smem:[#allocation5 + $0x13]] }
  0x7a   : > { %v2055_v33 = vsel %vm334_vm0, %v348_v25, %v349_v24  ;;  %v569_v42 = vsel %vm476_vm1, %v567_v31, %v568_v30  ;;  %v692_v25 = vmul.f32 %v2106_v2, %v690_v21  ;;  %v774_v31 = vstv %s1544_s7  ;;  %s2260_s7 = sld [smem:[#allocation5 + $0x49]]  ;;  %s2281_s8 = sld [smem:[#allocation5 + $0x2f]] }
  0x7b   : > { %v775_v39 = vmul.f32 %v2111_v5, %v774_v31 }
  0x7c   : > { %396 = vrot.lane.b32.xlu1 %v392_v29, %s1770_s24  ;;  %394 = vrot.lane.b32.xlu0 %v393_v37, %s1770_s24  ;;  %v357_v29 = vmul.f32 %v356_v26, %v1929_v0  ;;  %v691_v26 = vmul.f32 %v2111_v5, %v690_v21 }
  0x7e   : > { %v361_v37 = vrot.slane %v357_v29, 1  ;;  %v758_v29 = vmul.f32 %v2111_v5, %v757_v22 }
  0x80   : > { %413 = vrot.lane.b32.xlu1 %v409_v38, %s1770_s24  ;;  %411 = vrot.lane.b32.xlu0 %v410_v43, %s1770_s24  ;;  %v471_v38 = vstv %s2020_s19  ;;  %v2066_v40 = vsel %vm334_vm0, %v361_v37, %v362_v36  ;;  %v598_v43 = vmul.f32 %v596_v27, %v1932_v1  ;;  %v704_v27 = vstv %s1539_s6  ;;  %s2173_s19 = sld [smem:[#allocation5 + $0x1b]]  ;;  %s2245_s6 = sld [smem:[#allocation5 + $0x2e]] }
  0x81   : > { %v472_v41 = vmul.f32 %v471_v38, %v1929_v0  ;;  %v1049_v18 = vstv %s2260_s7  ;;  %s2403_s7 = sld [smem:[#allocation5 + $0x27]] }
  0x82   : > { %v602_v54 = vrot.slane %v598_v43, 2 }
  0x83   : > { %v477_v48 = vrot.slane %v472_v41, 2  ;;  %v776_v41 = vmul.f32 %v2106_v2, %v774_v31 }
  0x84   : > { %430 = vrot.lane.b32.xlu1 %v426_v44, %s1771_s29  ;;  %428 = vrot.lane.b32.xlu0 %v427_v49, %s1771_s29  ;;  %v2075_v44 = vmul.f32 %v471_v38, %v1932_v1  ;;  %v486_v49 = vmul.f32 %v485_v45, %v1929_v0  ;;  %v762_v38 = vrot.slane %v758_v29, 1 }
  0x85   : > { %v780_v45 = vrot.slane %v776_v41, 1 }
  0x86   : > { %v478_v50 = vrot.slane %v2075_v44, 2  ;;  %v490_v52 = vrot.slane %v486_v49, 2 }
  0x88   : > { %447 = vrot.lane.b32.xlu1 %v443_v47, %s1771_s29  ;;  %445 = vrot.lane.b32.xlu0 %v444_v53, %s1771_s29  ;;  %v584_v47 = vrot.slane %v580_v32, 2  ;;  %v498_v53 = vstv %s2048_s25  ;;  %v706_v32 = vmul.f32 %v2106_v2, %v704_v27  ;;  %s2181_s25 = sld [smem:[#allocation5 + $0x11]] }
  0x89   : > { %v499_v59 = vmul.f32 %v498_v53, %v1929_v0  ;;  %v2095_v60 = vmul.f32 %v498_v53, %v1932_v1 }
  0x8a   : > { %v586_v57 = vsel %vm476_vm1, %v584_v47, %v585_v46  ;;  %v792_v47 = vmul.f32 %v2111_v5, %v791_v35 }
  0x8b   : > { %v504_v63 = vrot.slane %v2095_v60, 2 }
  0x8c   : > { %464 = vrot.lane.b32.xlu1 %v460_v55, %s1771_s29  ;;  %462 = vrot.lane.b32.xlu0 %v461_v61, %s1771_s29  ;;  %v2089_v55 = vsel %vm476_vm1, %v477_v48, %v478_v50  ;;  %v2100_v61 = vsel %vm476_vm1, %v490_v52, %v491_v56  ;;  %v808_v48 = vstv %s1546_s9  ;;  %v825_v52 = vstv %s1547_s10  ;;  %s2283_s9 = sld [smem:[#allocation5 + $0x16]]  ;;  %s2290_s10 = sld [smem:[#allocation5 + $0x4a]] }
  0x90   : > { %521 = vrot.lane.b32.xlu1 %v517_v62, %s1770_s24  ;;  %519 = vrot.lane.b32.xlu0 %v518_v8, %s1770_s24  ;;  %v503_v62 = vrot.slane %v499_v59, 2  ;;  %v635_v8 = vmul.f32 %v2111_v5, %v634_v3  ;;  %v826_v59 = vmul.f32 %v2111_v5, %v825_v52 }
  0x92   : > { %v2116_v6 = vsel %vm476_vm1, %v503_v62, %v504_v63  ;;  %v827_v62 = vmul.f32 %v2106_v2, %v825_v52  ;;  %v1091_v44 = vstv %s2290_s10  ;;  %s1569_s10 = sld [smem:[#allocation5 + $0x15]] }
  0x94   : > { %538 = vrot.lane.b32.xlu1 %v534_v4, %s1770_s24  ;;  %536 = vrot.lane.b32.xlu0 %v535_v16, %s1770_s24  ;;  %v603_v4 = vsel %vm476_vm1, %v601_v58, %v602_v54  ;;  %v663_v16 = vmul.f32 %v2111_v5, %v662_v13  ;;  %v810_v58 = vmul.f32 %v2106_v2, %v808_v48  ;;  %v831_v9 = vrot.slane %v827_v62, 1 }
  0x98   : > { %555 = vrot.lane.b32.xlu1 %v551_v20, %s1770_s24  ;;  %553 = vrot.lane.b32.xlu0 %v552_v34, %s1770_s24  ;;  %v677_v20 = vmul.f32 %v2111_v5, %v676_v17  ;;  %v705_v34 = vmul.f32 %v2111_v5, %v704_v27 }
  0x9c   : > { %572 = vrot.lane.b32.xlu1 %v568_v30, %s1771_s29  ;;  %570 = vrot.lane.b32.xlu0 %v569_v42, %s1771_s29  ;;  %v759_v30 = vmul.f32 %v2106_v2, %v757_v22  ;;  %v793_v42 = vmul.f32 %v2106_v2, %v791_v35  ;;  %v932_v35 = vstv %s2170_s4  ;;  %s2335_s4 = sld [smem:[#allocation5 + $0x4d]] }
  0x9e   : > { %v763_v37 = vrot.slane %v759_v30, 1  ;;  %v797_v49 = vrot.slane %v793_v42, 1 }
  0xa0   : > { %589 = vrot.lane.b32.xlu1 %v585_v46, %s1771_s29  ;;  %587 = vrot.lane.b32.xlu0 %v586_v57, %s1771_s29  ;;  %v764_v43 = vsel %vm334_vm0, %v762_v38, %v763_v37  ;;  %v779_v46 = vrot.slane %v775_v39, 1  ;;  %v809_v57 = vmul.f32 %v2111_v5, %v808_v48  ;;  %v233_v38 = vstv %s2173_s19  ;;  %s2340_s19 = sld [smem:[#allocation5 + $0x9]] }
  0xa1   : > { %v219_v39 = vstv %s2176_s22  ;;  %v934_v48 = vmul.f32 %v2106_v2, %v932_v35  ;;  %s2346_s22 = sld [smem:[#allocation5 + $0x19]] }
  0xa2   : > { %v781_v53 = vsel %vm334_vm0, %v779_v46, %v780_v45 }
  0xa4   : > { %606 = vrot.lane.b32.xlu1 %v602_v54, %s1771_s29  ;;  %604 = vrot.lane.b32.xlu0 %v603_v4, %s1771_s29  ;;  %v796_v54 = vrot.slane %v792_v47, 1  ;;  %v814_v4 = vrot.slane %v810_v58, 1  ;;  %v239_v58 = vstv %s2189_s15  ;;  %s2359_s15 = sld [smem:[#allocation5 + $0x3f]] }
  0xa6   : > { %v798_v3 = vsel %vm334_vm0, %v796_v54, %v797_v49  ;;  %v234_v54 = vmul.f32 %v233_v38, %v1929_v0 }
  0xa8   : > { %641 = vrot.lane.b32.xlu1 %v636_v7, %s1770_s24  ;;  %639 = vrot.lane.b32.xlu0 %v635_v8, %s1770_s24  ;;  %v813_v7 = vrot.slane %v809_v57, 1  ;;  %v842_v8 = vstv %s1548_s11  ;;  %s2292_s11 = sld [smem:[#allocation5 + $0x31]] }
  0xa9   : > { %v843_v13 = vmul.f32 %v2111_v5, %v842_v8 }
  0xab   : > { %v847_v22 = vrot.slane %v843_v13, 1 }
  0xac   : > { %655 = vrot.lane.b32.xlu1 %v650_v11, %s1770_s24  ;;  %653 = vrot.lane.b32.xlu0 %v649_v12, %s1770_s24  ;;  %v830_v11 = vrot.slane %v826_v59, 1  ;;  %v815_v12 = vsel %vm334_vm0, %v813_v7, %v814_v4  ;;  %v938_v7 = vrot.slane %v934_v48, 2 }
  0xb0   : > { %669 = vrot.lane.b32.xlu1 %v664_v15, %s1770_s24  ;;  %667 = vrot.lane.b32.xlu0 %v663_v16, %s1770_s24  ;;  %v844_v15 = vmul.f32 %v2106_v2, %v842_v8  ;;  %v898_v16 = vstv %s1552_s12  ;;  %s2301_s12 = sld [smem:[#allocation5 + $0x4c]] }
  0xb1   : > { %v899_v17 = vmul.f32 %v2111_v5, %v898_v16 }
  0xb2   : > { %v848_v21 = vrot.slane %v844_v15, 1  ;;  %v241_v15 = vmul.f32 %v239_v58, %v1932_v1 }
  0xb3   : > { %v903_v29 = vrot.slane %v899_v17, 2  ;;  %v240_v17 = vmul.f32 %v239_v58, %v1929_v0 }
  0xb4   : > { %683 = vrot.lane.b32.xlu1 %v678_v19, %s1771_s29  ;;  %681 = vrot.lane.b32.xlu0 %v677_v20, %s1771_s29  ;;  %v900_v19 = vmul.f32 %v2106_v2, %v898_v16  ;;  %v832_v20 = vsel %vm334_vm0, %v830_v11, %v831_v9  ;;  %v849_v31 = vsel %vm334_vm0, %v847_v22, %v848_v21  ;;  %v223_v16 = vstv %s2201_s28  ;;  %s2374_s28 = sld [smem:[#allocation5 + $0x1a]] }
  0xb6   : > { %v904_v27 = vrot.slane %v900_v19, 2 }
  0xb8   : > { %697 = vrot.lane.b32.xlu1 %v692_v25, %s1771_s29  ;;  %695 = vrot.lane.b32.xlu0 %v691_v26, %s1771_s29  ;;  %v915_v25 = vstv %s2161_s18  ;;  %v227_v26 = vstv %s2165_s23  ;;  %v905_v42 = vsel %vm476_vm1, %v903_v29, %v904_v27  ;;  %s2316_s18 = sld [smem:[#allocation5 + $0x17]]  ;;  %s2328_s23 = sld [smem:[#allocation5 + $0x32]] }
  0xb9   : > { %v228_v41 = vmul.f32 %v227_v26, %v1929_v0  ;;  %v229_v11 = vmul.f32 %v227_v26, %v1932_v1  ;;  %v983_v29 = vstv %s2212_s30  ;;  %v242_v0 = vadd.f32 %v240_v17, %v223_v16  ;;  %v2264_v17 = vld [vmem:[%s1914_s21 + $0x20] sm:$0xff]  ;;  %s2389_s30 = sld [smem:[#allocation5 + $0x35]] }
  0xba   : > { %v1092_v51 = vmul.f32 %v2264_v17, %v1091_v44 }
  0xbb   : > { %v230_v57 = vadd.f32 %v228_v41, %v219_v39 }
  0xbc   : > { %711 = vrot.lane.b32.xlu1 %v706_v32, %s1771_s29  ;;  %709 = vrot.lane.b32.xlu0 %v705_v34, %s1771_s29  ;;  %v916_v32 = vmul.f32 %v2111_v5, %v915_v25  ;;  %v917_v34 = vmul.f32 %v2106_v2, %v915_v25 }
  0xbe   : > { %v921_v46 = vrot.slane %v917_v34, 2  ;;  %v920_v47 = vrot.slane %v916_v32, 2  ;;  %v231_v32 = vadd.f32 %v229_v11, %v219_v39  ;;  %v985_v39 = vmul.f32 %v2106_v2, %v983_v29 }
  0xc0   : > { %767 = vrot.lane.b32.xlu1 %v763_v37, %s1770_s24  ;;  %765 = vrot.lane.b32.xlu0 %v764_v43, %s1770_s24  ;;  %v933_v43 = vmul.f32 %v2111_v5, %v932_v35  ;;  %v243_v35 = vadd.f32 %v241_v15, %v223_v16  ;;  %v1021_v15 = vstv %s2238_s5  ;;  %s2394_s5 = sld [smem:[#allocation5 + $0xc]] }
  0xc2   : > { %v937_v8 = vrot.slane %v933_v43, 2  ;;  %v984_v43 = vmul.f32 %v2111_v5, %v983_v29 }
  0xc4   : > { %784 = vrot.lane.b32.xlu1 %v780_v45, %s1770_s24  ;;  %782 = vrot.lane.b32.xlu0 %v781_v53, %s1770_s24  ;;  %v221_v53 = vstv %s2185_s26  ;;  %s2356_s26 = sld [smem:[#allocation5 + $0x34]] }
  0xc5   : > { %v236_v13 = vadd.f32 %v234_v54, %v221_v53 }
  0xc8   : > { %801 = vrot.lane.b32.xlu1 %v797_v49, %s1770_s24  ;;  %799 = vrot.lane.b32.xlu0 %v798_v3, %s1770_s24  ;;  %v949_v49 = vstv %s2181_s25  ;;  %s2352_s25 = sld [smem:[#allocation5 + $0x24]] }
  0xc9   : > { %v950_v59 = vmul.f32 %v2111_v5, %v949_v49  ;;  %v951_v62 = vmul.f32 %v2106_v2, %v949_v49 }
  0xcb   : > { %v955_v19 = vrot.slane %v951_v62, 2  ;;  %v988_v62 = vrot.slane %v984_v43, 2 }
  0xcc   : > { %818 = vrot.lane.b32.xlu1 %v814_v4, %s1771_s29  ;;  %816 = vrot.lane.b32.xlu0 %v815_v12, %s1771_s29  ;;  %v922_v4 = vsel %vm476_vm1, %v920_v47, %v921_v46 }
  0xd0   : > { %835 = vrot.lane.b32.xlu1 %v831_v9, %s1771_s29  ;;  %833 = vrot.lane.b32.xlu0 %v832_v20, %s1771_s29  ;;  %v966_v9 = vstv %s2197_s27  ;;  %v954_v20 = vrot.slane %v950_v59, 2  ;;  %s2365_s27 = sld [smem:[#allocation5 + $0x4f]] }
  0xd1   : > { %v968_v26 = vmul.f32 %v2106_v2, %v966_v9 }
  0xd2   : > { %v2191_v30 = vpop.permute.xlu1 %264  ;;  %v251_v37 = vpop.permute.xlu0 %250 }
  0xd3   : > { %v256_v22 = vadd.f32 %v251_v37, %v230_v57 }
  0xd4   : > { %852 = vrot.lane.b32.xlu1 %v848_v21, %s1771_s29  ;;  %850 = vrot.lane.b32.xlu0 %v849_v31, %s1771_s29  ;;  %v967_v21 = vmul.f32 %v2111_v5, %v966_v9  ;;  %v235_v31 = vmul.f32 %v233_v38, %v1932_v1  ;;  %v972_v1 = vrot.slane %v968_v26, 2 }
  0xd6   : > { %v2208_v45 = vpop.permute.xlu1 %266  ;;  %v253_v52 = vpop.permute.xlu0 %252  ;;  %v971_v37 = vrot.slane %v967_v21, 2  ;;  %v237_v48 = vadd.f32 %v235_v31, %v221_v53 }
  0xd7   : > { %v257_v49 = vadd.f32 %v253_v52, %v231_v32 }
  0xd8   : > { %908 = vrot.lane.b32.xlu1 %v904_v27, %s1770_s24  ;;  %906 = vrot.lane.b32.xlu0 %v905_v42, %s1770_s24  ;;  %v939_v27 = vsel %vm476_vm1, %v937_v8, %v938_v7  ;;  %v956_v42 = vsel %vm476_vm1, %v954_v20, %v955_v19  ;;  %v271_v53 = vadd.f32 %v2208_v45, %v237_v48 }
  0xda   : > { %v281_v3 = vpop.permute.xlu1 %280  ;;  %v279_v12 = vpop.permute.xlu0 %278 }
  0xdb   : > { %v285_v58 = vadd.f32 %v281_v3, %v243_v35 }
  0xdc   : > { %925 = vrot.lane.b32.xlu1 %v921_v46, %s1770_s24  ;;  %923 = vrot.lane.b32.xlu0 %v922_v4, %s1770_s24  ;;  %v270_v46 = vadd.f32 %v2191_v30, %v236_v13  ;;  %v284_v30 = vadd.f32 %v279_v12, %v242_v0  ;;  %v2255_v13 = vld [vmem:[%s1914_s21 + $0x28] sm:$0xff]  ;;  %s2274_s21 = sld [smem:[#allocation5 + $0x14]]  ;;  %v1050_v0 = vmul.f32 %v2264_v17, %v1049_v18 }
  0xde   : > { %v295_v25 = vpop.permute.xlu1 %294  ;;  %v293_v34 = vpop.permute.xlu0 %292 }
  0xdf   : > { %v298_v41 = vadd.f32 %v293_v34, %v256_v22  ;;  %v299_v59 = vadd.f32 %v295_v25, %v257_v49  ;;  %v1035_v22 = vstv %s2245_s6  ;;  %s2401_s6 = sld [smem:[#allocation5 + $0x50]] }
  0xe0   : > { %942 = vrot.lane.b32.xlu1 %v938_v7, %s1770_s24  ;;  %940 = vrot.lane.b32.xlu0 %v939_v27, %s1770_s24  ;;  %v989_v7 = vrot.slane %v985_v39, 2  ;;  %v1037_v29 = vmul.f32 %v2255_v13, %v1035_v22  ;;  %v1036_v31 = vmul.f32 %v2264_v17, %v1035_v22  ;;  %v1077_v39 = vstv %s2281_s8  ;;  %s1550_s8 = sld [smem:[#allocation5 + $0x2a]] }
  0xe1   : > { %v340_v38 = vadd.f32 %v2038_v23, %v298_v41  ;;  %v973_v23 = vsel %vm476_vm1, %v971_v37, %v972_v1  ;;  %v341_v12 = vadd.f32 %v336_v14, %v299_v59  ;;  %v1023_v14 = vmul.f32 %v2255_v13, %v1021_v15 }
  0xe2   : > { %v309_v47 = vpop.permute.xlu1 %308  ;;  %v307_v54 = vpop.permute.xlu0 %306  ;;  %v990_v16 = vsel %vm476_vm1, %v988_v62, %v989_v7  ;;  %v1051_v41 = vmul.f32 %v2255_v13, %v1049_v18 }
  0xe3   : > { %v312_v57 = vadd.f32 %v307_v54, %v270_v46  ;;  %v313_v11 = vadd.f32 %v309_v47, %v271_v53 }
  0xe4   : > { %959 = vrot.lane.b32.xlu1 %v955_v19, %s1771_s29  ;;  %957 = vrot.lane.b32.xlu0 %v956_v42, %s1771_s29  ;;  %v1063_v42 = vstv %s2274_s21  ;;  %s2413_s21 = sld [smem:[#allocation5 + $0x42]] }
  0xe5   : > { %v353_v52 = vadd.f32 %v2055_v33, %v312_v57  ;;  %v354_v28 = vadd.f32 %v349_v24, %v313_v11  ;;  %v1144_v57 = vstv %s2283_s9  ;;  %v1093_v11 = vmul.f32 %v2255_v13, %v1091_v44  ;;  %s1551_s9 = sld [smem:[#allocation5 + $0x45]] }
  0xe6   : > { %v323_v4 = vpop.permute.xlu1 %322  ;;  %v321_v3 = vpop.permute.xlu0 %320  ;;  %v1285_v44 = vstv %s2346_s22  ;;  %s2521_s22 = sld [smem:[#allocation5 + $0x4e]] }
  0xe7   : > { %v327_v8 = vadd.f32 %v323_v4, %v285_v58  ;;  %v326_v9 = vadd.f32 %v321_v3, %v284_v30  ;;  %v1079_v30 = vmul.f32 %v2255_v13, %v1077_v39  ;;  %v1078_v4 = vmul.f32 %v2264_v17, %v1077_v39 }
  0xe8   : > { %976 = vrot.lane.b32.xlu1 %v972_v1, %s1771_s29  ;;  %974 = vrot.lane.b32.xlu0 %v973_v23, %s1771_s29  ;;  %v1065_v1 = vmul.f32 %v2255_v13, %v1063_v42  ;;  %v1161_v3 = vstv %s2292_s11  ;;  %s1570_s11 = sld [smem:[#allocation5 + $0x30]] }
  0xe9   : > { %v367_v33 = vadd.f32 %v362_v36, %v327_v8  ;;  %v366_v19 = vadd.f32 %v2066_v40, %v326_v9  ;;  %v1022_v36 = vmul.f32 %v2264_v17, %v1021_v15 }
  0xea   : > { %v380_v45 = vpop.permute.xlu1 %379  ;;  %v378_v21 = vpop.permute.xlu0 %377 }
  0xeb   : > { %v384_v20 = vadd.f32 %v380_v45, %v341_v12  ;;  %v383_v10 = vadd.f32 %v378_v21, %v340_v38  ;;  %v1064_v38 = vmul.f32 %v2264_v17, %v1063_v42  ;;  %v1178_v12 = vstv %s2301_s12  ;;  %s1561_s12 = sld [smem:[#allocation5 + $0x2d]] }
  0xec   : > { %993 = vrot.lane.b32.xlu1 %v989_v7, %s1771_s29  ;;  %991 = vrot.lane.b32.xlu0 %v990_v16, %s1771_s29  ;;  %v1162_v16 = vmul.f32 %v2264_v17, %v1161_v3  ;;  %v1179_v60 = vmul.f32 %v2264_v17, %v1178_v12 }
  0xee   : > { %v397_v25 = vpop.permute.xlu1 %396  ;;  %v395_v27 = vpop.permute.xlu0 %394 }
  0xef   : > { %v401_v40 = vadd.f32 %v397_v25, %v354_v28  ;;  %v400_v26 = vadd.f32 %v395_v27, %v353_v52  ;;  %v1145_v52 = vmul.f32 %v2264_v17, %v1144_v57 }
  0xf0   : > { %1028 = vrot.lane.b32.xlu1 %v1023_v14, %s1770_s24  ;;  %1026 = vrot.lane.b32.xlu0 %v1022_v36, %s1770_s24  ;;  %v1166_v36 = vrot.slane %v1162_v16, 1 }
  0xf2   : > { %v414_v24 = vpop.permute.xlu1 %413  ;;  %v412_v34 = vpop.permute.xlu0 %411 }
  0xf3   : > { %v418_v32 = vadd.f32 %v414_v24, %v367_v33  ;;  %v417_v35 = vadd.f32 %v412_v34, %v366_v19  ;;  %v1149_v33 = vrot.slane %v1145_v52, 1  ;;  %v1163_v19 = vmul.f32 %v2255_v13, %v1161_v3 }
  0xf4   : > { %1042 = vrot.lane.b32.xlu1 %v1037_v29, %s1770_s24  ;;  %1040 = vrot.lane.b32.xlu0 %v1036_v31, %s1770_s24  ;;  %v1183_v29 = vrot.slane %v1179_v60, 1  ;;  %v1212_v34 = vstv %s2328_s23  ;;  %v1287_v3 = vmul.f32 %v2255_v13, %v1285_v44  ;;  %v1319_v60 = vstv %s2365_s27  ;;  %s2489_s23 = sld [smem:[#allocation5 + $0x4b]] }
  0xf5   : > { %v1167_v28 = vrot.slane %v1163_v19, 1  ;;  %v628_v19 = vstv %s2359_s15 }
  0xf6   : > { %v431_v37 = vpop.permute.xlu1 %430  ;;  %v429_v46 = vpop.permute.xlu0 %428 }
  0xf7   : > { %v435_v43 = vadd.f32 %v431_v37, %v384_v20  ;;  %v434_v47 = vadd.f32 %v429_v46, %v383_v10  ;;  %v1168_v18 = vsel %vm334_vm0, %v1166_v36, %v1167_v28  ;;  %v1213_v37 = vmul.f32 %v2264_v17, %v1212_v34 }
  0xf8   : > { %1056 = vrot.lane.b32.xlu1 %v1051_v41, %s1770_s24  ;;  %1054 = vrot.lane.b32.xlu0 %v1050_v0, %s1770_s24 }
  0xf9   : > { %v483_v48 = vadd.f32 %v478_v50, %v435_v43  ;;  %v482_v54 = vadd.f32 %v2089_v55, %v434_v47  ;;  %v1146_v55 = vmul.f32 %v2255_v13, %v1144_v57 }
  0xfa   : > { %v448_v49 = vpop.permute.xlu1 %447  ;;  %v446_v59 = vpop.permute.xlu0 %445 }
  0xfb   : > { %v452_v58 = vadd.f32 %v448_v49, %v401_v40  ;;  %v451_v62 = vadd.f32 %v446_v59, %v400_v26  ;;  %v1195_v40 = vstv %s2316_s18  ;;  %s2485_s18 = sld [smem:[#allocation5 + $0x48]] }
  0xfc   : > { %1070 = vrot.lane.b32.xlu1 %v1065_v1, %s1771_s29  ;;  %1068 = vrot.lane.b32.xlu0 %v1064_v38, %s1771_s29  ;;  %v1196_v24 = vmul.f32 %v2264_v17, %v1195_v40  ;;  %v1214_v1 = vmul.f32 %v2255_v13, %v1212_v34  ;;  %v1229_v38 = vstv %s2335_s4  ;;  %s2495_s4 = sld [smem:[#allocation5 + $0x18]] }
  0xfd   : > { %v496_v50 = vadd.f32 %v491_v56, %v452_v58  ;;  %v495_v7 = vadd.f32 %v2100_v61, %v451_v62  ;;  %v1150_v56 = vrot.slane %v1146_v55, 1  ;;  %v1230_v57 = vmul.f32 %v2264_v17, %v1229_v38 }
  0xfe   : > { %v465_v23 = vpop.permute.xlu1 %464  ;;  %v463_v8 = vpop.permute.xlu0 %462  ;;  %v1200_v47 = vrot.slane %v1196_v24, 1  ;;  %v1231_v58 = vmul.f32 %v2255_v13, %v1229_v38  ;;  %v1336_v24 = vstv %s2374_s28 }
  0xff   : > { %v469_v53 = vadd.f32 %v465_v23, %v418_v32  ;;  %v468_v9 = vadd.f32 %v463_v8, %v417_v35  ;;  %v1197_v32 = vmul.f32 %v2255_v13, %v1195_v40  ;;  %v622_v8 = vstv %s2352_s25  ;;  %s1596_s25 = smul.u32 48, %s2618_s16 }
 0x100   : > { %1084 = vrot.lane.b32.xlu1 %v1079_v30, %s1771_s29  ;;  %1082 = vrot.lane.b32.xlu0 %v1078_v4, %s1771_s29  ;;  %v1218_v30 = vrot.slane %v1214_v1, 1  ;;  %v1217_v4 = vrot.slane %v1213_v37, 1  ;;  %v1235_v52 = vrot.slane %v1231_v58, 1  ;;  %v623_v16 = vmul.f32 %v2111_v5, %v622_v8 }
 0x101   : > { %v509_v61 = vadd.f32 %v504_v63, %v469_v53  ;;  %v508_v45 = vadd.f32 %v2116_v6, %v468_v9  ;;  %v1180_v63 = vmul.f32 %v2255_v13, %v1178_v12  ;;  %v1151_v6 = vsel %vm334_vm0, %v1149_v33, %v1150_v56  ;;  %s217_s15 = scalar_lea.vmem %s2596_s3, %s1596_s25 }
 0x102   : > { %v522_v15 = vpop.permute.xlu1 %521  ;;  %v520_v21 = vpop.permute.xlu0 %519  ;;  %v1201_v46 = vrot.slane %v1197_v32, 1  ;;  %v1234_v53 = vrot.slane %v1230_v57, 1  ;;  %v1338_v1 = vmul.f32 %v2255_v13, %v1336_v24  ;;  %v1337_v38 = vmul.f32 %v2264_v17, %v1336_v24 }
 0x103   : > { %v526_v20 = vadd.f32 %v522_v15, %v483_v48  ;;  %v525_v10 = vadd.f32 %v520_v21, %v482_v54  ;;  %v1184_v26 = vrot.slane %v1180_v63, 1  ;;  %v616_v54 = vstv %s2340_s19  ;;  %s2502_s19 = sld [smem:[#allocation5 + $0x33]] }
 0x104   : > { %1098 = vrot.lane.b32.xlu1 %v1093_v11, %s1771_s29  ;;  %1096 = vrot.lane.b32.xlu0 %v1092_v51, %s1771_s29  ;;  %v1202_v62 = vsel %vm334_vm0, %v1200_v47, %v1201_v46  ;;  %v1219_v11 = vsel %vm334_vm0, %v1217_v4, %v1218_v30  ;;  %v617_v51 = vmul.f32 %v2111_v5, %v616_v54  ;;  %v1302_v15 = vstv %s2356_s26 }
 0x105   : > { %v1185_v42 = vsel %vm334_vm0, %v1183_v29, %v1184_v26  ;;  %v1236_v21 = vsel %vm334_vm0, %v1234_v53, %v1235_v52  ;;  %v1303_v36 = vmul.f32 %v2264_v17, %v1302_v15  ;;  %v1353_v57 = vstv %s2389_s30 }
 0x106   : > { %v539_v14 = vpop.permute.xlu1 %538  ;;  %v537_v25 = vpop.permute.xlu0 %536  ;;  %v1342_v4 = vrot.slane %v1338_v1, 2 }
 0x107   : > { %v543_v22 = vadd.f32 %v539_v14, %v496_v50  ;;  %v542_v27 = vadd.f32 %v537_v25, %v495_v7  ;;  %v618_v7 = vmul.f32 %v2106_v2, %v616_v54 }
 0x108   : > { %1154 = vrot.lane.b32.xlu1 %v1150_v56, %s1770_s24  ;;  %1152 = vrot.lane.b32.xlu0 %v1151_v6, %s1770_s24  ;;  %v1286_v56 = vmul.f32 %v2264_v17, %v1285_v44  ;;  %v1341_v44 = vrot.slane %v1337_v38, 2 }
 0x10a   : > { %v556_v31 = vpop.permute.xlu1 %555  ;;  %v554_v41 = vpop.permute.xlu0 %553  ;;  %v1290_v6 = vrot.slane %v1286_v56, 2  ;;  %v1343_v56 = vsel %vm476_vm1, %v1341_v44, %v1342_v4 }
 0x10b   : > { %v560_v35 = vadd.f32 %v556_v31, %v509_v61  ;;  %v559_v0 = vadd.f32 %v554_v41, %v508_v45  ;;  %v624_v45 = vmul.f32 %v2106_v2, %v622_v8  ;;  %v1321_v31 = vmul.f32 %v2255_v13, %v1319_v60 }
 0x10c   : > { %1171 = vrot.lane.b32.xlu1 %v1167_v28, %s1770_s24  ;;  %1169 = vrot.lane.b32.xlu0 %v1168_v18, %s1770_s24  ;;  %v1304_v28 = vmul.f32 %v2255_v13, %v1302_v15  ;;  %v1320_v18 = vmul.f32 %v2264_v17, %v1319_v60 }
 0x10d   : > { %v1325_v47 = vrot.slane %v1321_v31, 2 }
 0x10e   : > { %v573_v43 = vpop.permute.xlu1 %572  ;;  %v571_v48 = vpop.permute.xlu0 %570  ;;  %v1308_v41 = vrot.slane %v1304_v28, 2  ;;  %v1324_v54 = vrot.slane %v1320_v18, 2 }
 0x10f   : > { %v577_v39 = vadd.f32 %v573_v43, %v526_v20  ;;  %v576_v49 = vadd.f32 %v571_v48, %v525_v10  ;;  %v1291_v10 = vrot.slane %v1287_v3, 2 }
 0x110   : > { %1188 = vrot.lane.b32.xlu1 %v1184_v26, %s1770_s24  ;;  %1186 = vrot.lane.b32.xlu0 %v1185_v42, %s1770_s24  ;;  %v629_v26 = vmul.f32 %v2111_v5, %v628_v19 }
 0x111   : > { %v620_v20 = vadd.f32 %v618_v7, %v577_v39  ;;  %v619_v14 = vadd.f32 %v617_v51, %v576_v49  ;;  %v1326_v7 = vsel %vm476_vm1, %v1324_v54, %v1325_v47 }
 0x112   : > { %v590_v59 = vpop.permute.xlu1 %589  ;;  %v588_v55 = vpop.permute.xlu0 %587 }
 0x113   : > { %v594_v50 = vadd.f32 %v590_v59, %v543_v22  ;;  %v593_v23 = vadd.f32 %v588_v55, %v542_v27  ;;  %v630_v27 = vmul.f32 %v2106_v2, %v628_v19  ;;  %v1354_v55 = vmul.f32 %v2264_v17, %v1353_v57 }
 0x114   : > { %1205 = vrot.lane.b32.xlu1 %v1201_v46, %s1771_s29  ;;  %1203 = vrot.lane.b32.xlu0 %v1202_v62, %s1771_s29 }
 0x115   : > { %v626_v29 = vadd.f32 %v624_v45, %v594_v50  ;;  %v625_v34 = vadd.f32 %v623_v16, %v593_v23  ;;  %v1355_v50 = vmul.f32 %v2255_v13, %v1353_v57 }
 0x116   : > { %v607_v9 = vpop.permute.xlu1 %606  ;;  %v605_v12 = vpop.permute.xlu0 %604 }
 0x117   : > { %v611_v61 = vadd.f32 %v607_v9, %v560_v35  ;;  %v610_v33 = vadd.f32 %v605_v12, %v559_v0  ;;  %v1292_v35 = vsel %vm476_vm1, %v1290_v6, %v1291_v10  ;;  %v1307_v0 = vrot.slane %v1303_v36, 2 }
 0x118   : > { %1222 = vrot.lane.b32.xlu1 %v1218_v30, %s1771_s29  ;;  %1220 = vrot.lane.b32.xlu0 %v1219_v11, %s1771_s29  ;;  %v718_v30 = vstv %s2394_s5  ;;  %v731_v11 = vstv %s2403_s7  ;;  %v1358_v12 = vrot.slane %v1354_v55, 2 }
 0x119   : > { %v632_v46 = vadd.f32 %v630_v27, %v611_v61  ;;  %v631_v48 = vadd.f32 %v629_v26, %v610_v33  ;;  %v1309_v49 = vsel %vm476_vm1, %v1307_v0, %v1308_v41  ;;  %v719_v3 = vmul.f32 %v2111_v5, %v718_v30 }
 0x11a   : > { %v642_v63 = vpop.permute.xlu1 %641  ;;  %v640_v25 = vpop.permute.xlu0 %639  ;;  %v720_v9 = vmul.f32 %v2106_v2, %v718_v30  ;;  %v1359_v61 = vrot.slane %v1355_v50, 2  ;;  %v732_v16 = vmul.f32 %v2111_v5, %v731_v11  ;;  %v733_v19 = vmul.f32 %v2106_v2, %v731_v11 }
 0x11b   : > { %v646_v22 = vadd.f32 %v642_v63, %v620_v20  ;;  %v645_v40 = vadd.f32 %v640_v25, %v619_v14  ;;  %v744_v14 = vstv %s2413_s21 }
 0x11c   : > { %1239 = vrot.lane.b32.xlu1 %v1235_v52, %s1771_s29  ;;  %1237 = vrot.lane.b32.xlu0 %v1236_v21, %s1771_s29  ;;  %v1370_v52 = vstv %s2401_s6  ;;  %v724_v60 = vrot.slane %v720_v9, 1  ;;  %v1360_v6 = vsel %vm476_vm1, %v1358_v12, %v1359_v61  ;;  %v736_v25 = vrot.slane %v732_v16, 1 }
 0x11d   : > { %v1372_v33 = vmul.f32 %v2255_v13, %v1370_v52  ;;  %v1371_v45 = vmul.f32 %v2264_v17, %v1370_v52  ;;  %v745_v31 = vmul.f32 %v2111_v5, %v744_v14  ;;  %v746_v18 = vmul.f32 %v2106_v2, %v744_v14 }
 0x11e   : > { %v656_v32 = vpop.permute.xlu1 %655  ;;  %v654_v37 = vpop.permute.xlu0 %653 }
 0x11f   : > { %v660_v42 = vadd.f32 %v656_v32, %v626_v29  ;;  %v659_v43 = vadd.f32 %v654_v37, %v625_v34  ;;  %v1376_v36 = vrot.slane %v1372_v33, 2 }
 0x120   : > { %1295 = vrot.lane.b32.xlu1 %v1291_v10, %s1770_s24  ;;  %1293 = vrot.lane.b32.xlu0 %v1292_v35, %s1770_s24  ;;  %v723_v10 = vrot.slane %v719_v3, 1 }
 0x122   : > { %v670_v39 = vpop.permute.xlu1 %669  ;;  %v668_v59 = vpop.permute.xlu0 %667  ;;  %v725_v29 = vsel %vm334_vm0, %v723_v10, %v724_v60 }
 0x123   : > { %v674_v58 = vadd.f32 %v670_v39, %v632_v46  ;;  %v673_v62 = vadd.f32 %v668_v59, %v631_v48  ;;  %v750_v46 = vrot.slane %v746_v18, 1 }
 0x124   : > { %1312 = vrot.lane.b32.xlu1 %v1308_v41, %s1770_s24  ;;  %1310 = vrot.lane.b32.xlu0 %v1309_v49, %s1770_s24 }
 0x126   : > { %v684_v23 = vpop.permute.xlu1 %683  ;;  %v682_v8 = vpop.permute.xlu0 %681 }
 0x127   : > { %v688_v53 = vadd.f32 %v684_v23, %v646_v22  ;;  %v687_v51 = vadd.f32 %v682_v8, %v645_v40  ;;  %v1375_v22 = vrot.slane %v1371_v45, 2  ;;  %v737_v40 = vrot.slane %v733_v19, 1 }
 0x128   : > { %1329 = vrot.lane.b32.xlu1 %v1325_v47, %s1770_s24  ;;  %1327 = vrot.lane.b32.xlu0 %v1326_v7, %s1770_s24  ;;  %s1549_s24 = sld [smem:[#allocation5 + $0xf]]  ;;  %v872_v8 = vstv %s1550_s8  ;;  %v885_v45 = vstv %s1551_s9 }
 0x129   : > { %v729_v32 = vadd.f32 %v724_v60, %v688_v53  ;;  %v728_v35 = vadd.f32 %v725_v29, %v687_v51  ;;  %v1377_v41 = vsel %vm476_vm1, %v1375_v22, %v1376_v36  ;;  %v738_v37 = vsel %vm334_vm0, %v736_v25, %v737_v40 }
 0x12a   : > { %v698_v15 = vpop.permute.xlu1 %697  ;;  %v696_v21 = vpop.permute.xlu0 %695  ;;  %v887_v14 = vmul.f32 %v2106_v2, %v885_v45 }
 0x12b   : > { %v702_v20 = vadd.f32 %v698_v15, %v660_v42  ;;  %v701_v63 = vadd.f32 %v696_v21, %v659_v43  ;;  %v749_v43 = vrot.slane %v745_v31, 1  ;;  %v874_v15 = vmul.f32 %v2106_v2, %v872_v8 }
 0x12c   : > { %1346 = vrot.lane.b32.xlu1 %v1342_v4, %s1771_s29  ;;  %1344 = vrot.lane.b32.xlu0 %v1343_v56, %s1771_s29  ;;  %v873_v56 = vmul.f32 %v2111_v5, %v872_v8  ;;  %v891_v29 = vrot.slane %v887_v14, 2 }
 0x12d   : > { %v742_v1 = vadd.f32 %v737_v40, %v702_v20  ;;  %v741_v39 = vadd.f32 %v738_v37, %v701_v63  ;;  %v751_v54 = vsel %vm334_vm0, %v749_v43, %v750_v46  ;;  %v878_v60 = vrot.slane %v874_v15, 2 }
 0x12e   : > { %v712_v28 = vpop.permute.xlu1 %711  ;;  %v710_v26 = vpop.permute.xlu0 %709  ;;  %v859_v44 = vstv %s1549_s24  ;;  %v877_v20 = vrot.slane %v873_v56, 2  ;;  %v886_v63 = vmul.f32 %v2111_v5, %v885_v45  ;;  %v1105_v56 = vstv %s1569_s10 }
 0x12f   : > { %v716_v27 = vadd.f32 %v712_v28, %v674_v58  ;;  %v715_v24 = vadd.f32 %v710_v26, %v673_v62  ;;  %v860_v23 = vmul.f32 %v2111_v5, %v859_v44  ;;  %v861_v7 = vmul.f32 %v2106_v2, %v859_v44 }
 0x130   : > { %1363 = vrot.lane.b32.xlu1 %v1359_v61, %s1771_s29  ;;  %1361 = vrot.lane.b32.xlu0 %v1360_v6, %s1771_s29  ;;  %v890_v26 = vrot.slane %v886_v63, 2  ;;  %v1009_v45 = vstv %s1561_s12 }
 0x131   : > { %v755_v58 = vadd.f32 %v750_v46, %v716_v27  ;;  %v754_v62 = vadd.f32 %v751_v54, %v715_v24  ;;  %v864_v11 = vrot.slane %v860_v23, 2  ;;  %v865_v51 = vrot.slane %v861_v7, 2 }
 0x132   : > { %v768_v34 = vpop.permute.xlu1 %767  ;;  %v766_v42 = vpop.permute.xlu0 %765  ;;  %v879_v27 = vsel %vm476_vm1, %v877_v20, %v878_v60  ;;  %v892_v5 = vsel %vm476_vm1, %v890_v26, %v891_v29 }
 0x133   : > { %v772_v0 = vadd.f32 %v768_v34, %v729_v32  ;;  %v771_v47 = vadd.f32 %v766_v42, %v728_v35  ;;  %v866_v19 = vsel %vm476_vm1, %v864_v11, %v865_v51 }
 0x134   : > { %1380 = vrot.lane.b32.xlu1 %v1376_v36, %s1771_s29  ;;  %1378 = vrot.lane.b32.xlu0 %v1377_v41, %s1771_s29  ;;  %s1560_s29 = sld [smem:[#allocation5 + $0x12]] }
 0x136   : > { %v785_v38 = vpop.permute.xlu1 %784  ;;  %v783_v49 = vpop.permute.xlu0 %782 }
 0x137   : > { %v789_v48 = vadd.f32 %v785_v38, %v742_v1  ;;  %v788_v57 = vadd.f32 %v783_v49, %v741_v39 }
 0x13a   : > { %v802_v59 = vpop.permute.xlu1 %801  ;;  %v800_v4 = vpop.permute.xlu0 %799 }
 0x13b   : > { %v806_v30 = vadd.f32 %v802_v59, %v755_v58  ;;  %v805_v50 = vadd.f32 %v800_v4, %v754_v62 }
 0x13e   : > { %v819_v55 = vpop.permute.xlu1 %818  ;;  %v817_v53 = vpop.permute.xlu0 %816 }
 0x13f   : > { %v823_v52 = vadd.f32 %v819_v55, %v772_v0  ;;  %v822_v3 = vadd.f32 %v817_v53, %v771_v47 }
 0x141   : > { %v870_v28 = vadd.f32 %v865_v51, %v823_v52  ;;  %v869_v22 = vadd.f32 %v866_v19, %v822_v3  ;;  %v1003_v51 = vstv %s1560_s29 }
 0x142   : > { %v836_v9 = vpop.permute.xlu1 %835  ;;  %v834_v12 = vpop.permute.xlu0 %833  ;;  %v1004_v20 = vmul.f32 %v2264_v17, %v1003_v51 }
 0x143   : > { %v840_v61 = vadd.f32 %v836_v9, %v789_v48  ;;  %v839_v33 = vadd.f32 %v834_v12, %v788_v57 }
 0x145   : > { %v883_v18 = vadd.f32 %v878_v60, %v840_v61  ;;  %v882_v32 = vadd.f32 %v879_v27, %v839_v33  ;;  %v1118_v61 = vstv %s1570_s11  ;;  %v1005_v33 = vmul.f32 %v2255_v13, %v1003_v51 }
 0x146   : > { %v853_v16 = vpop.permute.xlu1 %852  ;;  %v851_v10 = vpop.permute.xlu0 %850  ;;  %v1107_v60 = vmul.f32 %v2255_v13, %v1105_v56  ;;  %v1119_v63 = vmul.f32 %v2264_v17, %v1118_v61  ;;  %v1120_v14 = vmul.f32 %v2255_v13, %v1118_v61 }
 0x147   : > { %v857_v21 = vadd.f32 %v853_v16, %v806_v30  ;;  %v856_v6 = vadd.f32 %v851_v10, %v805_v50  ;;  %v1015_v10 = vstv %s2485_s18 }
 0x149   : > { %v896_v2 = vadd.f32 %v891_v29, %v857_v21  ;;  %v895_v42 = vadd.f32 %v892_v5, %v856_v6  ;;  %v1106_v21 = vmul.f32 %v2264_v17, %v1105_v56  ;;  %v1011_v6 = vmul.f32 %v2255_v13, %v1009_v45 }
 0x14a   : > { %v909_v36 = vpop.permute.xlu1 %908  ;;  %v907_v40 = vpop.permute.xlu0 %906  ;;  %v1124_v5 = vrot.slane %v1120_v14, 1  ;;  %v1259_v56 = vstv %s2502_s19 }
 0x14b   : > { %v913_v25 = vadd.f32 %v909_v36, %v870_v28  ;;  %v912_v31 = vadd.f32 %v907_v40, %v869_v22  ;;  %v1131_v40 = vstv %s2489_s23  ;;  %v1261_v14 = vmul.f32 %v2255_v13, %v1259_v56 }
 0x14e   : > { %v926_v24 = vpop.permute.xlu1 %925  ;;  %v924_v35 = vpop.permute.xlu0 %923 }
 0x14f   : > { %v930_v34 = vadd.f32 %v926_v24, %v883_v18  ;;  %v929_v41 = vadd.f32 %v924_v35, %v882_v32  ;;  %v1110_v18 = vrot.slane %v1106_v21, 1  ;;  %v1111_v32 = vrot.slane %v1107_v60, 1 }
 0x150   : > { %v1123_v35 = vrot.slane %v1119_v63, 1  ;;  %v1260_v21 = vmul.f32 %v2264_v17, %v1259_v56 }
 0x152   : > { %v943_v0 = vpop.permute.xlu1 %942  ;;  %v941_v43 = vpop.permute.xlu0 %940 }
 0x153   : > { %v2453_v37 = vadd.f32 %v943_v0, %v896_v2  ;;  %v2455_v46 = vadd.f32 %v941_v43, %v895_v42  ;;  %v1133_v0 = vmul.f32 %v2255_v13, %v1131_v40  ;;  %v1246_v43 = vstv %s2495_s4 }
 0x156   : > { %v960_v47 = vpop.permute.xlu1 %959  ;;  %v958_v1 = vpop.permute.xlu0 %957 }
 0x157   : > { %v964_v15 = vadd.f32 %v960_v47, %v913_v25  ;;  %v963_v19 = vadd.f32 %v958_v1, %v912_v31  ;;  %v1010_v25 = vmul.f32 %v2264_v17, %v1009_v45  ;;  %v1017_v31 = vmul.f32 %v2255_v13, %v1015_v10 }
 0x158   : > { %v1016_v1 = vmul.f32 %v2264_v17, %v1015_v10 }
 0x159   : > { %v1007_v22 = vadd.f32 %v1005_v33, %v964_v15  ;;  %v1006_v29 = vadd.f32 %v1004_v20, %v963_v19  ;;  %v1112_v15 = vsel %vm334_vm0, %v1110_v18, %v1111_v32  ;;  %v1247_v33 = vmul.f32 %v2264_v17, %v1246_v43 }
 0x15a   : > { %v977_v38 = vpop.permute.xlu1 %976  ;;  %v975_v39 = vpop.permute.xlu0 %974  ;;  %v1137_v19 = vrot.slane %v1133_v0, 1 }
 0x15b   : > { %v981_v36 = vadd.f32 %v977_v38, %v930_v34  ;;  %v980_v26 = vadd.f32 %v975_v39, %v929_v41  ;;  %v1132_v34 = vmul.f32 %v2264_v17, %v1131_v40 }
 0x15d   : > { %v1013_v47 = vadd.f32 %v1011_v6, %v981_v36  ;;  %v1136_v45 = vrot.slane %v1132_v34, 1  ;;  %v1251_v36 = vrot.slane %v1247_v33, 2 }
 0x15e   : > { %v2457_v48 = vpop.permute.xlu1 %993  ;;  %v2459_v49 = vpop.permute.xlu0 %991 }
 0x15f   : > { %v998_v41 = vadd.f32 %v2457_v48, %v2453_v37  ;;  %v1248_v37 = vmul.f32 %v2255_v13, %v1246_v43  ;;  %v1138_v40 = vsel %vm334_vm0, %v1136_v45, %v1137_v19 }
 0x162   : > { %v1029_v54 = vpop.permute.xlu1 %1028  ;;  %v1027_v57 = vpop.permute.xlu0 %1026 }
 0x163   : > { %v1033_v24 = vadd.f32 %v1029_v54, %v1007_v22  ;;  %v1032_v2 = vadd.f32 %v1027_v57, %v1006_v29  ;;  %v997_v54 = vadd.f32 %v2459_v49, %v2455_v46  ;;  %v1012_v57 = vadd.f32 %v1010_v25, %v980_v26 }
 0x164   : > { %v1019_v46 = vadd.f32 %v1017_v31, %v998_v41 }
 0x165   : > { %v1018_v10 = vadd.f32 %v1016_v1, %v997_v54 }
 0x166   : > { %v2461_v58 = vpop.permute.xlu1 %1042  ;;  %v2463_v59 = vpop.permute.xlu0 %1040 }
 0x167   : > { %v1047_v61 = vadd.f32 %v2461_v58, %v1013_v47  ;;  %v1046_v48 = vadd.f32 %v2463_v59, %v1012_v57 }
 0x16a   : > { %v2465_v62 = vpop.permute.xlu1 %1056  ;;  %v2467_v30 = vpop.permute.xlu0 %1054 }
 0x16b   : > { %v1061_v59 = vadd.f32 %v2465_v62, %v1019_v46  ;;  %v1060_v22 = vadd.f32 %v2467_v30, %v1018_v10  ;;  %v1264_v62 = vrot.slane %v1260_v21, 2 }
 0x16e   : > { %v1071_v4 = vpop.permute.xlu1 %1070  ;;  %v1069_v44 = vpop.permute.xlu0 %1068 }
 0x16f   : > { %v1075_v38 = vadd.f32 %v1071_v4, %v1033_v24  ;;  %v1074_v51 = vadd.f32 %v1069_v44, %v1032_v2  ;;  %v1125_v4 = vsel %vm334_vm0, %v1123_v35, %v1124_v5  ;;  %v1265_v2 = vrot.slane %v1261_v14, 2 }
 0x171   : > { %v1116_v44 = vadd.f32 %v1111_v32, %v1075_v38  ;;  %v1115_v63 = vadd.f32 %v1112_v15, %v1074_v51 }
 0x172   : > { %v2469_v50 = vpop.permute.xlu1 %1084  ;;  %v2471_v55 = vpop.permute.xlu0 %1082 }
 0x173   : > { %v1089_v49 = vadd.f32 %v2469_v50, %v1047_v61  ;;  %v1088_v60 = vadd.f32 %v2471_v55, %v1046_v48  ;;  %v1252_v50 = vrot.slane %v1248_v37, 2  ;;  %v1272_v55 = vstv %s2521_s22 }
 0x175   : > { %v1129_v31 = vadd.f32 %v1124_v5, %v1089_v49  ;;  %v1128_v32 = vadd.f32 %v1125_v4, %v1088_v60 }
 0x176   : > { %v2473_v23 = vpop.permute.xlu1 %1098  ;;  %v2475_v7 = vpop.permute.xlu0 %1096 }
 0x177   : > { %v1103_v29 = vadd.f32 %v2473_v23, %v1061_v59  ;;  %v1273_v23 = vmul.f32 %v2264_v17, %v1272_v55 }
 0x179   : > { %v1277_v54 = vrot.slane %v1273_v23, 2 }
 0x17a   : > { %v2477_v52 = vpop.permute.xlu1 %1154  ;;  %v2479_v53 = vpop.permute.xlu0 %1152 }
 0x17b   : > { %v1159_v6 = vadd.f32 %v2477_v52, %v1116_v44  ;;  %v1158_v25 = vadd.f32 %v2479_v53, %v1115_v63  ;;  %v1102_v52 = vadd.f32 %v2475_v7, %v1060_v22  ;;  %v1253_v53 = vsel %vm476_vm1, %v1251_v36, %v1252_v50 }
 0x17c   : > { %v1142_v7 = vadd.f32 %v1137_v19, %v1103_v29 }
 0x17d   : > { %v1141_v41 = vadd.f32 %v1138_v40, %v1102_v52 }
 0x17e   : > { %v2481_v8 = vpop.permute.xlu1 %1171  ;;  %v2483_v3 = vpop.permute.xlu0 %1169 }
 0x17f   : > { %v1176_v30 = vadd.f32 %v2481_v8, %v1129_v31  ;;  %v1175_v5 = vadd.f32 %v2483_v3, %v1128_v32  ;;  %v1266_v8 = vsel %vm476_vm1, %v1264_v62, %v1265_v2 }
 0x182   : > { %v2487_v9 = vpop.permute.xlu1 %1188  ;;  %v2491_v11 = vpop.permute.xlu0 %1186 }
 0x183   : > { %v1193_v38 = vadd.f32 %v2487_v9, %v1142_v7  ;;  %v1192_v3 = vadd.f32 %v2491_v11, %v1141_v41 }
 0x186   : > { %v2493_v12 = vpop.permute.xlu1 %1205  ;;  %v2498_v16 = vpop.permute.xlu0 %1203 }
 0x187   : > { %v1210_v18 = vadd.f32 %v2493_v12, %v1159_v6  ;;  %v1209_v35 = vadd.f32 %v2498_v16, %v1158_v25  ;;  %v1274_v12 = vmul.f32 %v2255_v13, %v1272_v55 }
 0x189   : > { %v1257_v16 = vadd.f32 %v1252_v50, %v1210_v18  ;;  %v1256_v1 = vadd.f32 %v1253_v53, %v1209_v35  ;;  %v1278_v13 = vrot.slane %v1274_v12, 2 }
 0x18a   : > { %v2509_v28 = vpop.permute.xlu1 %1222  ;;  %v2513_v27 = vpop.permute.xlu0 %1220 }
 0x18b   : > { %v1227_v0 = vadd.f32 %v2509_v28, %v1176_v30  ;;  %v1226_v47 = vadd.f32 %v2513_v27, %v1175_v5  ;;  %v1279_v48 = vsel %vm476_vm1, %v1277_v54, %v1278_v13 }
 0x18d   : > { %v1270_v56 = vadd.f32 %v1265_v2, %v1227_v0  ;;  %v1269_v33 = vadd.f32 %v1266_v8, %v1226_v47 }
 0x18e   : > { %v2518_v42 = vpop.permute.xlu1 %1239  ;;  %v2526_v39 = vpop.permute.xlu0 %1237 }
 0x18f   : > { %v1244_v28 = vadd.f32 %v2518_v42, %v1193_v38  ;;  %v1243_v27 = vadd.f32 %v2526_v39, %v1192_v3 }
 0x191   : > { %v1283_v19 = vadd.f32 %v1278_v13, %v1244_v28  ;;  %v1282_v46 = vadd.f32 %v1279_v48, %v1243_v27 }
 0x192   : > { %v1296_v20 = vpop.permute.xlu1 %1295  ;;  %v1294_v58 = vpop.permute.xlu0 %1293 }
 0x193   : > { %v1300_v17 = vadd.f32 %v1296_v20, %v1257_v16  ;;  %v1299_v57 = vadd.f32 %v1294_v58, %v1256_v1 }
 0x196   : > { %v1313_v26 = vpop.permute.xlu1 %1312  ;;  %v1311_v24 = vpop.permute.xlu0 %1310 }
 0x197   : > { %v1317_v37 = vadd.f32 %v1313_v26, %v1270_v56  ;;  %v1316_v4 = vadd.f32 %v1311_v24, %v1269_v33 }
 0x19a   : > { %v1330_v34 = vpop.permute.xlu1 %1329  ;;  %v1328_v43 = vpop.permute.xlu0 %1327 }
 0x19b   : > { %v1334_v44 = vadd.f32 %v1330_v34, %v1283_v19  ;;  %v1333_v21 = vadd.f32 %v1328_v43, %v1282_v46 }
 0x19e   : > { %v1347_v51 = vpop.permute.xlu1 %1346  ;;  %v1345_v15 = vpop.permute.xlu0 %1344 }
 0x19f   : > { %v1351_v61 = vadd.f32 %v1347_v51, %v1300_v17  ;;  %v1350_v9 = vadd.f32 %v1345_v15, %v1299_v57 }
 0x1a1   : > { %v1387_v11 = vmax.f32 %v1351_v61, 0.0  ;;  %v1386_v45 = vmax.f32 %v1350_v9, 0.0 }
 0x1a2   : > { %v1364_v42 = vpop.permute.xlu1 %1363  ;;  %v1362_v39 = vpop.permute.xlu0 %1361 }
 0x1a3   : > { %1391 = vst.msk [vmem:[%s217_s15 + $0x8] sm:$0x3f] %vm1390_vm2, %v1387_v11  ;;  %v1368_v20 = vadd.f32 %v1364_v42, %v1317_v37  ;;  %v1367_v49 = vadd.f32 %v1362_v39, %v1316_v4 }
 0x1a4   : > { %1389 = vst.msk [vmem:[%s217_s15] sm:$0xff] %vm1388_vm3, %v1386_v45 }
 0x1a5   : > { %v1393_v58 = vmax.f32 %v1368_v20, 0.0  ;;  %v1392_v10 = vmax.f32 %v1367_v49, 0.0 }
 0x1a6   : > { %v1381_v60 = vpop.permute.xlu1 %1380  ;;  %v1379_v14 = vpop.permute.xlu0 %1378 }
 0x1a7   : > { %1588 = vst.msk [vmem:[%s217_s15 + $0x18] sm:$0x3f] %vm1390_vm2, %v1393_v58  ;;  %v1385_v63 = vadd.f32 %v1381_v60, %v1334_v44  ;;  %v1384_v59 = vadd.f32 %v1379_v14, %v1333_v21 }
 0x1a8   : > { %1587 = vst.msk [vmem:[%s217_s15 + $0x10] sm:$0xff] %vm1388_vm3, %v1392_v10 }
 0x1a9   : > { %v1398_v6 = vmax.f32 %v1385_v63, 0.0  ;;  %v1397_v36 = vmax.f32 %v1384_v59, 0.0 }
 0x1ab   : > { %1590 = vst.msk [vmem:[%s217_s15 + $0x28] sm:$0x3f] %vm1390_vm2, %v1398_v6 }
 0x1ac   : > { %1589 = vst.msk [vmem:[%s217_s15 + $0x20] sm:$0xff] %vm1388_vm3, %v1397_v36 }
 0x1ad PF: > { %p15_p11 = scmp.ge.s32.totalorder %s1814_s17, 4   ;;  %s2613_s12 = smov %s1755_s13 }
 0x1ae   : > { %s2614_s13 = smov %s1759_s14  ;;  %s2615_s14 = smov %s1824_s20 }
 0x1af   : > { %s2616_s15 = smov %s1814_s17  ;;  %17 = sbr.rel (!%p15_p11) target bundleno = 5 (0x5), region = 85 }
 0x1b6   :  { %1423 = vsyncpa [#allocation3], 1 }
 0x1b7   :  { %1425 = vsyncpa [#allocation3 + $0x1], 1 }
 0x1b8   :  { %1426 = vsyncpa [#allocation4], 1 }
 0x1b9   :  { %1428 = vsyncpa [#allocation4 + $0x1], 1 }
 0x1ba   :  { %1429 = vsyncpa [#allocation7], 1 }

</bundles_post_ra>
